<compile_context>
chip_gen: v5e
topology: v5e:2x2
jax: 0.10.0
libtpu: 0.0.40
codegen_flags: <defaults>
</compile_context>

<pallas_src>
import math

import jax
import jax.numpy as jnp
from jax.experimental import pallas as pl
from jax.experimental.pallas import tpu as pltpu

FEAT_DIM = 32                    # feat_dim of the module (small test size)
NUM_AA = 21
NUM_ATOMS = 14
CRD_FEAT = NUM_AA * NUM_ATOMS * 3          # 882 (dense reference layout)

PACK_W = 48                      # packed per-residue lane width (42 crd + aa + 1 + pad)
AA_LANE = NUM_ATOMS * 3          # 42: lane holding aatype as float
IND_LANE = AA_LANE + 1           # 43: lane holding the 1.0 indicator

TM_DEFAULT = 1024                # rows (residues) per grid step


def _round_up(x, m):
    return ((x + m - 1) // m) * m


# ----------------------------------------------------------------------------
# Pallas kernel: blockwise (no wide expansion) layer-1 + fused 4-layer MLP
# ----------------------------------------------------------------------------
def _encoder_kernel(x_ref, w1_ref, b1_ref, w2_ref, b2_ref, w3_ref, b3_ref,
                    w4_ref, b4_ref, out_ref):
    x = x_ref[...]                                         # (TM, PACK_W) f32
    rows = x.shape[0]
    d2 = w1_ref.shape[1]

    # aatype rides in lane 42 as an exact small float (0..20); compare in f32.
    aa_col = x[:, AA_LANE:AA_LANE + 1]                     # (TM, 1)

    # Layer 1: accumulate over the 21 aatype blocks.  Rows whose aatype does
    # not select block `a` contribute exact zeros, so the sum equals the
    # reference crd_feat @ W1c + E[aa] @ W1a (indicator lane -> EW1a row).
    # Static unroll: traced once, 21 short-K matmuls on the MXU.
    h = jnp.zeros((rows, d2), jnp.float32)
    for a in range(NUM_AA):
        xa = jnp.where(aa_col == jnp.float32(a), x, 0.0)   # (TM, PACK_W)
        wa = w1_ref[a * PACK_W:(a + 1) * PACK_W, :]        # static, sublane-aligned
        h = h + jnp.dot(xa, wa, preferred_element_type=jnp.float32)
    h = jnp.maximum(h + b1_ref[...], 0.0)

    # Layer 2
    h = jnp.dot(h, w2_ref[...], preferred_element_type=jnp.float32) + b2_ref[...]
    h = jnp.maximum(h, 0.0)

    # Layer 3
    h = jnp.dot(h, w3_ref[...], preferred_element_type=jnp.float32) + b3_ref[...]
    h = jnp.maximum(h, 0.0)

    # Layer 4 (no activation).  Output is (TM, 32): stores are masked vst but
    # after removing the wide expansion the store slot has ample slack, so the
    # (TM,32)->(TM//4,128) relayout was judged not worth its XLU cost.
    out_ref[...] = (jnp.dot(h, w4_ref[...], preferred_element_type=jnp.float32)
                    + b4_ref[...])


def _full_spec(shape):
    nd = len(shape)
    return pl.BlockSpec(shape, lambda i: (0,) * nd)


def encoder_mlp_pallas(x_pack, kparams, tm=TM_DEFAULT):
    """x_pack: (M, PACK_W) f32 packed rows -> (M, D) f32."""
    W1b, b1, W2, b2, W3, b3, W4, b4 = kparams
    D = W4.shape[1]
    M = x_pack.shape[0]

    if M < tm:
        # Tiny input: one right-sized tile; pad at most 7 rows to a sublane
        # multiple (padded rows have aa lane 0.0 -> harmless, sliced off).
        tm = _round_up(max(M, 8), 8)
        if tm != M:
            x_pack = jnp.pad(x_pack, ((0, tm - M), (0, 0)))
    Mp = x_pack.shape[0]
    grid = pl.cdiv(Mp, tm)
    # No full-input pad for large M: a ragged last block is clamped by Pallas;
    # its rows only affect output rows >= M, which are sliced off below.

    out = pl.pallas_call(
        _encoder_kernel,
        out_shape=jax.ShapeDtypeStruct((Mp, D), jnp.float32),
        grid=(grid,),
        in_specs=[
            pl.BlockSpec((tm, PACK_W), lambda i: (i, 0)),   # packed residue rows
            _full_spec(W1b.shape), _full_spec(b1.shape),
            _full_spec(W2.shape), _full_spec(b2.shape),
            _full_spec(W3.shape), _full_spec(b3.shape),
            _full_spec(W4.shape), _full_spec(b4.shape),
        ],
        out_specs=pl.BlockSpec((tm, D), lambda i: (i, 0)),
        compiler_params=pltpu.CompilerParams(
            dimension_semantics=("parallel",),              # megacore on v7x
            vmem_limit_bytes=16 * 1024 * 1024),             # right-sized (+headroom)
    )(x_pack, W1b, b1, W2, b2, W3, b3, W4, b4)
    return out[:M]


# ----------------------------------------------------------------------------
# Plain-JAX glue: geometry / frame / packing (cheap elementwise prep)
# ----------------------------------------------------------------------------
def _normalize(v, eps=1e-6):
    return v / (jnp.linalg.norm(v, ord=2, axis=-1, keepdims=True) + eps)


def _construct_3d_basis(center, p1, p2):
    v1 = p1 - center
    e1 = _normalize(v1)
    v2 = p2 - center
    u2 = v2 - jnp.sum(e1 * v2, axis=-1, keepdims=True) * e1
    e2 = _normalize(u2)
    e3 = jnp.cross(e1, e2)
    return jnp.stack([e1, e2, e3], axis=-1)            # (N, L, 3, 3) columns


def _local_coords(pos14, atom_mask):
    """Masked local coordinates, (N, L, 14, 3)."""
    R = _construct_3d_basis(pos14[:, :, 1], pos14[:, :, 2], pos14[:, :, 0])
    t = pos14[:, :, 1]
    d = pos14 - t[:, :, None, :]
    crd14 = jnp.einsum('nlik,nlai->nlak', R, d)        # p = R^T (q - t)
    return jnp.where(atom_mask[:, :, :, None], crd14, jnp.zeros_like(crd14))


def build_packed_input(aa, pos14, atom_mask):
    """Returns (N*L, PACK_W) float32: [crd14 (42) | aa | 1.0 | zeros]."""
    N, L = aa.shape
    crd14 = _local_coords(pos14, atom_mask)
    M = N * L
    crd = crd14.reshape(M, NUM_ATOMS * 3).astype(jnp.float32)
    aa_col = aa.reshape(M, 1).astype(jnp.float32)
    ind_col = jnp.ones((M, 1), jnp.float32)
    pad = jnp.zeros((M, PACK_W - IND_LANE - 1), jnp.float32)
    return jnp.concatenate([crd, aa_col, ind_col, pad], axis=1)


def pack_params(params):
    """One-time weight repack (call at parameter-load time, NOT per forward):
    fold E@W1a into a (NUM_AA*PACK_W, 2D) layer-1 weight matching the packed
    per-block in-kernel layout."""
    E, W1, b1, W2, b2, W3, b3, W4, b4 = params
    D2 = W1.shape[1]
    W1c = W1[:CRD_FEAT]                                 # (882, 2D)
    W1a = W1[CRD_FEAT:]                                 # (D,   2D)
    EW1a = E @ W1a                                      # (21,  2D)
    Wb = jnp.zeros((NUM_AA, PACK_W, D2), jnp.float32)
    Wb = Wb.at[:, :NUM_ATOMS * 3, :].set(W1c.reshape(NUM_AA, NUM_ATOMS * 3, D2))
    Wb = Wb.at[:, IND_LANE, :].set(EW1a)                # indicator lane -> embedding term
    W1b = Wb.reshape(NUM_AA * PACK_W, D2)               # (1008, 2D)
    return (W1b, b1, W2, b2, W3, b3, W4, b4)


@jax.jit
def per_residue_encoder(aa, pos14, atom_mask, kparams):
    """Forward pass; `kparams` must be the pre-packed weights from pack_params."""
    N, L = aa.shape
    x_pack = build_packed_input(aa, pos14, atom_mask)
    out = encoder_mlp_pallas(x_pack, kparams)
    return out.reshape(N, L, out.shape[-1])


# ----------------------------------------------------------------------------
# Deterministic parameter init (shapes from PerResidueEncoder.__init__)
# ----------------------------------------------------------------------------
def init_params(key, feat_dim):
    D = feat_dim
    in_dim = CRD_FEAT + D

    def linear(k, fin, fout):
        kw, kb = jax.random.split(k)
        bound = 1.0 / math.sqrt(fin)
        W = jax.random.uniform(kw, (fin, fout), jnp.float32, -bound, bound)
        b = jax.random.uniform(kb, (1, fout), jnp.float32, -bound, bound)
        return W, b

    ks = jax.random.split(key, 5)
    E = jax.random.normal(ks[0], (NUM_AA, D), jnp.float32)      # nn.Embedding(21, D)
    W1, b1 = linear(ks[1], in_dim, 2 * D)
    W2, b2 = linear(ks[2], 2 * D, D)
    W3, b3 = linear(ks[3], D, D)
    W4, b4 = linear(ks[4], D, D)
    return (E, W1, b1, W2, b2, W3, b3, W4, b4)


# ----------------------------------------------------------------------------
# Pure-JAX reference (mirrors the PyTorch forward) for verification
# ----------------------------------------------------------------------------
def reference_forward(aa, pos14, atom_mask, params):
    E, W1, b1, W2, b2, W3, b3, W4, b4 = params
    N, L = aa.shape
    crd14 = _local_coords(pos14, atom_mask)
    place = aa[:, :, None, None, None] == jnp.arange(NUM_AA)[None, None, :, None, None]
    crd_expand = jnp.where(place, crd14[:, :, None, :, :], 0.0)  # (N,L,21,14,3)
    crd_feat = crd_expand.reshape(N, L, CRD_FEAT)
    aa_feat = E[aa]                                              # embedding lookup
    x = jnp.concatenate([crd_feat, aa_feat], axis=-1)
    h = jax.nn.relu(x @ W1 + b1[0])
    h = jax.nn.relu(h @ W2 + b2[0])
    h = jax.nn.relu(h @ W3 + b3[0])
    return h @ W4 + b4[0]


# ----------------------------------------------------------------------------
if __name__ == "__main__":
    key = jax.random.PRNGKey(0)
    k_aa, k_pos, k_mask, k_par = jax.random.split(key, 4)

    N, L = 2, 8
    aa = jax.random.randint(k_aa, (N, L), 0, NUM_AA, dtype=jnp.int32)
    pos14 = jax.random.normal(k_pos, (N, L, NUM_ATOMS, 3), jnp.float32)
    atom_mask = jax.random.uniform(k_mask, (N, L, NUM_ATOMS)) > 0.3

    params = init_params(k_par, FEAT_DIM)
    kparams = pack_params(params)         # hoisted: built once at load time

    out = per_residue_encoder(aa, pos14, atom_mask, kparams)
    out = jax.block_until_ready(out)

    ref = reference_forward(aa, pos14, atom_mask, params)
    assert out.shape == (N, L, FEAT_DIM)
    assert jnp.allclose(out, ref, rtol=1e-4, atol=1e-4), "mismatch vs reference"

    print("KERNEL_OK")
</pallas_src>

<mosaic_0001>
module attributes {stable_mosaic.version = 11 : i64} {
  func.func @_encoder_kernel(%arg0: i32, %arg1: memref<16x48xf32, #tpu.memory_space<vmem>>, %arg2: memref<1008x64xf32, #tpu.memory_space<vmem>>, %arg3: memref<1x64xf32, #tpu.memory_space<vmem>>, %arg4: memref<64x32xf32, #tpu.memory_space<vmem>>, %arg5: memref<1x32xf32, #tpu.memory_space<vmem>>, %arg6: memref<32x32xf32, #tpu.memory_space<vmem>>, %arg7: memref<1x32xf32, #tpu.memory_space<vmem>>, %arg8: memref<32x32xf32, #tpu.memory_space<vmem>>, %arg9: memref<1x32xf32, #tpu.memory_space<vmem>>, %arg10: memref<16x32xf32, #tpu.memory_space<vmem>>) attributes {dimension_semantics = [#tpu.dimension_semantics<parallel>], iteration_bounds = array<i64: 1>, scalar_prefetch = 0 : i64, scratch_operands = 0 : i64, tpu.core_type = #tpu.core_type<tc>, window_params = [{transform_indices = @transform_0, window_bounds = array<i64: 16, 48>}, {pipeline_mode = #tpu.pipeline_mode<synchronous>, transform_indices = @transform_1, window_bounds = array<i64: 1008, 64>}, {pipeline_mode = #tpu.pipeline_mode<synchronous>, transform_indices = @transform_2, window_bounds = array<i64: 1, 64>}, {pipeline_mode = #tpu.pipeline_mode<synchronous>, transform_indices = @transform_3, window_bounds = array<i64: 64, 32>}, {pipeline_mode = #tpu.pipeline_mode<synchronous>, transform_indices = @transform_4, window_bounds = array<i64: 1, 32>}, {pipeline_mode = #tpu.pipeline_mode<synchronous>, transform_indices = @transform_5, window_bounds = array<i64: 32, 32>}, {pipeline_mode = #tpu.pipeline_mode<synchronous>, transform_indices = @transform_6, window_bounds = array<i64: 1, 32>}, {pipeline_mode = #tpu.pipeline_mode<synchronous>, transform_indices = @transform_7, window_bounds = array<i64: 32, 32>}, {pipeline_mode = #tpu.pipeline_mode<synchronous>, transform_indices = @transform_8, window_bounds = array<i64: 1, 32>}, {transform_indices = @transform_9, window_bounds = array<i64: 16, 32>}]} {
    %c0 = arith.constant 0 : index
    %c0_0 = arith.constant 0 : index
    %0 = vector.load %arg1[%c0, %c0_0] : memref<16x48xf32, #tpu.memory_space<vmem>>, vector<16x48xf32>
    %1 = vector.extract_strided_slice %0 {offsets = [0, 42], sizes = [16, 1], strides = [1, 1]} : vector<16x48xf32> to vector<16x1xf32>
    %cst = arith.constant 0.000000e+00 : f32
    %2 = vector.broadcast %cst : f32 to vector<16x64xf32>
    %cst_1 = arith.constant 0.000000e+00 : f32
    %3 = vector.broadcast %cst_1 : f32 to vector<16x1xf32>
    %4 = arith.cmpf oeq, %1, %3 : vector<16x1xf32>
    %cst_2 = arith.constant 0.000000e+00 : f32
    %5 = vector.shape_cast %4 : vector<16x1xi1> to vector<16x1xi1>
    %6 = vector.broadcast %5 : vector<16x1xi1> to vector<16x48xi1>
    %7 = vector.broadcast %cst_2 : f32 to vector<16x48xf32>
    %8 = arith.select %6, %0, %7 : vector<16x48xi1>, vector<16x48xf32>
    %c0_3 = arith.constant 0 : index
    %c0_4 = arith.constant 0 : index
    %9 = vector.load %arg2[%c0_3, %c0_4] : memref<1008x64xf32, #tpu.memory_space<vmem>>, vector<48x64xf32>
    %cst_5 = arith.constant dense<0.000000e+00> : vector<16x64xf32>
    %10 = tpu.matmul %8, %9, %cst_5 {dimension_numbers = #tpu.dot_dimension_numbers<[1], [0], [0], [1], [0, 0, 1, 1], [], []>} : vector<16x48xf32>, vector<48x64xf32>, vector<16x64xf32> -> vector<16x64xf32>
    %11 = arith.addf %2, %10 : vector<16x64xf32>
    %cst_6 = arith.constant 1.000000e+00 : f32
    %12 = vector.broadcast %cst_6 : f32 to vector<16x1xf32>
    %13 = arith.cmpf oeq, %1, %12 : vector<16x1xf32>
    %cst_7 = arith.constant 0.000000e+00 : f32
    %14 = vector.shape_cast %13 : vector<16x1xi1> to vector<16x1xi1>
    %15 = vector.broadcast %14 : vector<16x1xi1> to vector<16x48xi1>
    %16 = vector.broadcast %cst_7 : f32 to vector<16x48xf32>
    %17 = arith.select %15, %0, %16 : vector<16x48xi1>, vector<16x48xf32>
    %c48 = arith.constant 48 : index
    %c0_8 = arith.constant 0 : index
    %18 = vector.load %arg2[%c48, %c0_8] : memref<1008x64xf32, #tpu.memory_space<vmem>>, vector<48x64xf32>
    %cst_9 = arith.constant dense<0.000000e+00> : vector<16x64xf32>
    %19 = tpu.matmul %17, %18, %cst_9 {dimension_numbers = #tpu.dot_dimension_numbers<[1], [0], [0], [1], [0, 0, 1, 1], [], []>} : vector<16x48xf32>, vector<48x64xf32>, vector<16x64xf32> -> vector<16x64xf32>
    %20 = arith.addf %11, %19 : vector<16x64xf32>
    %cst_10 = arith.constant 2.000000e+00 : f32
    %21 = vector.broadcast %cst_10 : f32 to vector<16x1xf32>
    %22 = arith.cmpf oeq, %1, %21 : vector<16x1xf32>
    %cst_11 = arith.constant 0.000000e+00 : f32
    %23 = vector.shape_cast %22 : vector<16x1xi1> to vector<16x1xi1>
    %24 = vector.broadcast %23 : vector<16x1xi1> to vector<16x48xi1>
    %25 = vector.broadcast %cst_11 : f32 to vector<16x48xf32>
    %26 = arith.select %24, %0, %25 : vector<16x48xi1>, vector<16x48xf32>
    %c96 = arith.constant 96 : index
    %c0_12 = arith.constant 0 : index
    %27 = vector.load %arg2[%c96, %c0_12] : memref<1008x64xf32, #tpu.memory_space<vmem>>, vector<48x64xf32>
    %cst_13 = arith.constant dense<0.000000e+00> : vector<16x64xf32>
    %28 = tpu.matmul %26, %27, %cst_13 {dimension_numbers = #tpu.dot_dimension_numbers<[1], [0], [0], [1], [0, 0, 1, 1], [], []>} : vector<16x48xf32>, vector<48x64xf32>, vector<16x64xf32> -> vector<16x64xf32>
    %29 = arith.addf %20, %28 : vector<16x64xf32>
    %cst_14 = arith.constant 3.000000e+00 : f32
    %30 = vector.broadcast %cst_14 : f32 to vector<16x1xf32>
    %31 = arith.cmpf oeq, %1, %30 : vector<16x1xf32>
    %cst_15 = arith.constant 0.000000e+00 : f32
    %32 = vector.shape_cast %31 : vector<16x1xi1> to vector<16x1xi1>
    %33 = vector.broadcast %32 : vector<16x1xi1> to vector<16x48xi1>
    %34 = vector.broadcast %cst_15 : f32 to vector<16x48xf32>
    %35 = arith.select %33, %0, %34 : vector<16x48xi1>, vector<16x48xf32>
    %c144 = arith.constant 144 : index
    %c0_16 = arith.constant 0 : index
    %36 = vector.load %arg2[%c144, %c0_16] : memref<1008x64xf32, #tpu.memory_space<vmem>>, vector<48x64xf32>
    %cst_17 = arith.constant dense<0.000000e+00> : vector<16x64xf32>
    %37 = tpu.matmul %35, %36, %cst_17 {dimension_numbers = #tpu.dot_dimension_numbers<[1], [0], [0], [1], [0, 0, 1, 1], [], []>} : vector<16x48xf32>, vector<48x64xf32>, vector<16x64xf32> -> vector<16x64xf32>
    %38 = arith.addf %29, %37 : vector<16x64xf32>
    %cst_18 = arith.constant 4.000000e+00 : f32
    %39 = vector.broadcast %cst_18 : f32 to vector<16x1xf32>
    %40 = arith.cmpf oeq, %1, %39 : vector<16x1xf32>
    %cst_19 = arith.constant 0.000000e+00 : f32
    %41 = vector.shape_cast %40 : vector<16x1xi1> to vector<16x1xi1>
    %42 = vector.broadcast %41 : vector<16x1xi1> to vector<16x48xi1>
    %43 = vector.broadcast %cst_19 : f32 to vector<16x48xf32>
    %44 = arith.select %42, %0, %43 : vector<16x48xi1>, vector<16x48xf32>
    %c192 = arith.constant 192 : index
    %c0_20 = arith.constant 0 : index
    %45 = vector.load %arg2[%c192, %c0_20] : memref<1008x64xf32, #tpu.memory_space<vmem>>, vector<48x64xf32>
    %cst_21 = arith.constant dense<0.000000e+00> : vector<16x64xf32>
    %46 = tpu.matmul %44, %45, %cst_21 {dimension_numbers = #tpu.dot_dimension_numbers<[1], [0], [0], [1], [0, 0, 1, 1], [], []>} : vector<16x48xf32>, vector<48x64xf32>, vector<16x64xf32> -> vector<16x64xf32>
    %47 = arith.addf %38, %46 : vector<16x64xf32>
    %cst_22 = arith.constant 5.000000e+00 : f32
    %48 = vector.broadcast %cst_22 : f32 to vector<16x1xf32>
    %49 = arith.cmpf oeq, %1, %48 : vector<16x1xf32>
    %cst_23 = arith.constant 0.000000e+00 : f32
    %50 = vector.shape_cast %49 : vector<16x1xi1> to vector<16x1xi1>
    %51 = vector.broadcast %50 : vector<16x1xi1> to vector<16x48xi1>
    %52 = vector.broadcast %cst_23 : f32 to vector<16x48xf32>
    %53 = arith.select %51, %0, %52 : vector<16x48xi1>, vector<16x48xf32>
    %c240 = arith.constant 240 : index
    %c0_24 = arith.constant 0 : index
    %54 = vector.load %arg2[%c240, %c0_24] : memref<1008x64xf32, #tpu.memory_space<vmem>>, vector<48x64xf32>
    %cst_25 = arith.constant dense<0.000000e+00> : vector<16x64xf32>
    %55 = tpu.matmul %53, %54, %cst_25 {dimension_numbers = #tpu.dot_dimension_numbers<[1], [0], [0], [1], [0, 0, 1, 1], [], []>} : vector<16x48xf32>, vector<48x64xf32>, vector<16x64xf32> -> vector<16x64xf32>
    %56 = arith.addf %47, %55 : vector<16x64xf32>
    %cst_26 = arith.constant 6.000000e+00 : f32
    %57 = vector.broadcast %cst_26 : f32 to vector<16x1xf32>
    %58 = arith.cmpf oeq, %1, %57 : vector<16x1xf32>
    %cst_27 = arith.constant 0.000000e+00 : f32
    %59 = vector.shape_cast %58 : vector<16x1xi1> to vector<16x1xi1>
    %60 = vector.broadcast %59 : vector<16x1xi1> to vector<16x48xi1>
    %61 = vector.broadcast %cst_27 : f32 to vector<16x48xf32>
    %62 = arith.select %60, %0, %61 : vector<16x48xi1>, vector<16x48xf32>
    %c288 = arith.constant 288 : index
    %c0_28 = arith.constant 0 : index
    %63 = vector.load %arg2[%c288, %c0_28] : memref<1008x64xf32, #tpu.memory_space<vmem>>, vector<48x64xf32>
    %cst_29 = arith.constant dense<0.000000e+00> : vector<16x64xf32>
    %64 = tpu.matmul %62, %63, %cst_29 {dimension_numbers = #tpu.dot_dimension_numbers<[1], [0], [0], [1], [0, 0, 1, 1], [], []>} : vector<16x48xf32>, vector<48x64xf32>, vector<16x64xf32> -> vector<16x64xf32>
    %65 = arith.addf %56, %64 : vector<16x64xf32>
    %cst_30 = arith.constant 7.000000e+00 : f32
    %66 = vector.broadcast %cst_30 : f32 to vector<16x1xf32>
    %67 = arith.cmpf oeq, %1, %66 : vector<16x1xf32>
    %cst_31 = arith.constant 0.000000e+00 : f32
    %68 = vector.shape_cast %67 : vector<16x1xi1> to vector<16x1xi1>
    %69 = vector.broadcast %68 : vector<16x1xi1> to vector<16x48xi1>
    %70 = vector.broadcast %cst_31 : f32 to vector<16x48xf32>
    %71 = arith.select %69, %0, %70 : vector<16x48xi1>, vector<16x48xf32>
    %c336 = arith.constant 336 : index
    %c0_32 = arith.constant 0 : index
    %72 = vector.load %arg2[%c336, %c0_32] : memref<1008x64xf32, #tpu.memory_space<vmem>>, vector<48x64xf32>
    %cst_33 = arith.constant dense<0.000000e+00> : vector<16x64xf32>
    %73 = tpu.matmul %71, %72, %cst_33 {dimension_numbers = #tpu.dot_dimension_numbers<[1], [0], [0], [1], [0, 0, 1, 1], [], []>} : vector<16x48xf32>, vector<48x64xf32>, vector<16x64xf32> -> vector<16x64xf32>
    %74 = arith.addf %65, %73 : vector<16x64xf32>
    %cst_34 = arith.constant 8.000000e+00 : f32
    %75 = vector.broadcast %cst_34 : f32 to vector<16x1xf32>
    %76 = arith.cmpf oeq, %1, %75 : vector<16x1xf32>
    %cst_35 = arith.constant 0.000000e+00 : f32
    %77 = vector.shape_cast %76 : vector<16x1xi1> to vector<16x1xi1>
    %78 = vector.broadcast %77 : vector<16x1xi1> to vector<16x48xi1>
    %79 = vector.broadcast %cst_35 : f32 to vector<16x48xf32>
    %80 = arith.select %78, %0, %79 : vector<16x48xi1>, vector<16x48xf32>
    %c384 = arith.constant 384 : index
    %c0_36 = arith.constant 0 : index
    %81 = vector.load %arg2[%c384, %c0_36] : memref<1008x64xf32, #tpu.memory_space<vmem>>, vector<48x64xf32>
    %cst_37 = arith.constant dense<0.000000e+00> : vector<16x64xf32>
    %82 = tpu.matmul %80, %81, %cst_37 {dimension_numbers = #tpu.dot_dimension_numbers<[1], [0], [0], [1], [0, 0, 1, 1], [], []>} : vector<16x48xf32>, vector<48x64xf32>, vector<16x64xf32> -> vector<16x64xf32>
    %83 = arith.addf %74, %82 : vector<16x64xf32>
    %cst_38 = arith.constant 9.000000e+00 : f32
    %84 = vector.broadcast %cst_38 : f32 to vector<16x1xf32>
    %85 = arith.cmpf oeq, %1, %84 : vector<16x1xf32>
    %cst_39 = arith.constant 0.000000e+00 : f32
    %86 = vector.shape_cast %85 : vector<16x1xi1> to vector<16x1xi1>
    %87 = vector.broadcast %86 : vector<16x1xi1> to vector<16x48xi1>
    %88 = vector.broadcast %cst_39 : f32 to vector<16x48xf32>
    %89 = arith.select %87, %0, %88 : vector<16x48xi1>, vector<16x48xf32>
    %c432 = arith.constant 432 : index
    %c0_40 = arith.constant 0 : index
    %90 = vector.load %arg2[%c432, %c0_40] : memref<1008x64xf32, #tpu.memory_space<vmem>>, vector<48x64xf32>
    %cst_41 = arith.constant dense<0.000000e+00> : vector<16x64xf32>
    %91 = tpu.matmul %89, %90, %cst_41 {dimension_numbers = #tpu.dot_dimension_numbers<[1], [0], [0], [1], [0, 0, 1, 1], [], []>} : vector<16x48xf32>, vector<48x64xf32>, vector<16x64xf32> -> vector<16x64xf32>
    %92 = arith.addf %83, %91 : vector<16x64xf32>
    %cst_42 = arith.constant 1.000000e+01 : f32
    %93 = vector.broadcast %cst_42 : f32 to vector<16x1xf32>
    %94 = arith.cmpf oeq, %1, %93 : vector<16x1xf32>
    %cst_43 = arith.constant 0.000000e+00 : f32
    %95 = vector.shape_cast %94 : vector<16x1xi1> to vector<16x1xi1>
    %96 = vector.broadcast %95 : vector<16x1xi1> to vector<16x48xi1>
    %97 = vector.broadcast %cst_43 : f32 to vector<16x48xf32>
    %98 = arith.select %96, %0, %97 : vector<16x48xi1>, vector<16x48xf32>
    %c480 = arith.constant 480 : index
    %c0_44 = arith.constant 0 : index
    %99 = vector.load %arg2[%c480, %c0_44] : memref<1008x64xf32, #tpu.memory_space<vmem>>, vector<48x64xf32>
    %cst_45 = arith.constant dense<0.000000e+00> : vector<16x64xf32>
    %100 = tpu.matmul %98, %99, %cst_45 {dimension_numbers = #tpu.dot_dimension_numbers<[1], [0], [0], [1], [0, 0, 1, 1], [], []>} : vector<16x48xf32>, vector<48x64xf32>, vector<16x64xf32> -> vector<16x64xf32>
    %101 = arith.addf %92, %100 : vector<16x64xf32>
    %cst_46 = arith.constant 1.100000e+01 : f32
    %102 = vector.broadcast %cst_46 : f32 to vector<16x1xf32>
    %103 = arith.cmpf oeq, %1, %102 : vector<16x1xf32>
    %cst_47 = arith.constant 0.000000e+00 : f32
    %104 = vector.shape_cast %103 : vector<16x1xi1> to vector<16x1xi1>
    %105 = vector.broadcast %104 : vector<16x1xi1> to vector<16x48xi1>
    %106 = vector.broadcast %cst_47 : f32 to vector<16x48xf32>
    %107 = arith.select %105, %0, %106 : vector<16x48xi1>, vector<16x48xf32>
    %c528 = arith.constant 528 : index
    %c0_48 = arith.constant 0 : index
    %108 = vector.load %arg2[%c528, %c0_48] : memref<1008x64xf32, #tpu.memory_space<vmem>>, vector<48x64xf32>
    %cst_49 = arith.constant dense<0.000000e+00> : vector<16x64xf32>
    %109 = tpu.matmul %107, %108, %cst_49 {dimension_numbers = #tpu.dot_dimension_numbers<[1], [0], [0], [1], [0, 0, 1, 1], [], []>} : vector<16x48xf32>, vector<48x64xf32>, vector<16x64xf32> -> vector<16x64xf32>
    %110 = arith.addf %101, %109 : vector<16x64xf32>
    %cst_50 = arith.constant 1.200000e+01 : f32
    %111 = vector.broadcast %cst_50 : f32 to vector<16x1xf32>
    %112 = arith.cmpf oeq, %1, %111 : vector<16x1xf32>
    %cst_51 = arith.constant 0.000000e+00 : f32
    %113 = vector.shape_cast %112 : vector<16x1xi1> to vector<16x1xi1>
    %114 = vector.broadcast %113 : vector<16x1xi1> to vector<16x48xi1>
    %115 = vector.broadcast %cst_51 : f32 to vector<16x48xf32>
    %116 = arith.select %114, %0, %115 : vector<16x48xi1>, vector<16x48xf32>
    %c576 = arith.constant 576 : index
    %c0_52 = arith.constant 0 : index
    %117 = vector.load %arg2[%c576, %c0_52] : memref<1008x64xf32, #tpu.memory_space<vmem>>, vector<48x64xf32>
    %cst_53 = arith.constant dense<0.000000e+00> : vector<16x64xf32>
    %118 = tpu.matmul %116, %117, %cst_53 {dimension_numbers = #tpu.dot_dimension_numbers<[1], [0], [0], [1], [0, 0, 1, 1], [], []>} : vector<16x48xf32>, vector<48x64xf32>, vector<16x64xf32> -> vector<16x64xf32>
    %119 = arith.addf %110, %118 : vector<16x64xf32>
    %cst_54 = arith.constant 1.300000e+01 : f32
    %120 = vector.broadcast %cst_54 : f32 to vector<16x1xf32>
    %121 = arith.cmpf oeq, %1, %120 : vector<16x1xf32>
    %cst_55 = arith.constant 0.000000e+00 : f32
    %122 = vector.shape_cast %121 : vector<16x1xi1> to vector<16x1xi1>
    %123 = vector.broadcast %122 : vector<16x1xi1> to vector<16x48xi1>
    %124 = vector.broadcast %cst_55 : f32 to vector<16x48xf32>
    %125 = arith.select %123, %0, %124 : vector<16x48xi1>, vector<16x48xf32>
    %c624 = arith.constant 624 : index
    %c0_56 = arith.constant 0 : index
    %126 = vector.load %arg2[%c624, %c0_56] : memref<1008x64xf32, #tpu.memory_space<vmem>>, vector<48x64xf32>
    %cst_57 = arith.constant dense<0.000000e+00> : vector<16x64xf32>
    %127 = tpu.matmul %125, %126, %cst_57 {dimension_numbers = #tpu.dot_dimension_numbers<[1], [0], [0], [1], [0, 0, 1, 1], [], []>} : vector<16x48xf32>, vector<48x64xf32>, vector<16x64xf32> -> vector<16x64xf32>
    %128 = arith.addf %119, %127 : vector<16x64xf32>
    %cst_58 = arith.constant 1.400000e+01 : f32
    %129 = vector.broadcast %cst_58 : f32 to vector<16x1xf32>
    %130 = arith.cmpf oeq, %1, %129 : vector<16x1xf32>
    %cst_59 = arith.constant 0.000000e+00 : f32
    %131 = vector.shape_cast %130 : vector<16x1xi1> to vector<16x1xi1>
    %132 = vector.broadcast %131 : vector<16x1xi1> to vector<16x48xi1>
    %133 = vector.broadcast %cst_59 : f32 to vector<16x48xf32>
    %134 = arith.select %132, %0, %133 : vector<16x48xi1>, vector<16x48xf32>
    %c672 = arith.constant 672 : index
    %c0_60 = arith.constant 0 : index
    %135 = vector.load %arg2[%c672, %c0_60] : memref<1008x64xf32, #tpu.memory_space<vmem>>, vector<48x64xf32>
    %cst_61 = arith.constant dense<0.000000e+00> : vector<16x64xf32>
    %136 = tpu.matmul %134, %135, %cst_61 {dimension_numbers = #tpu.dot_dimension_numbers<[1], [0], [0], [1], [0, 0, 1, 1], [], []>} : vector<16x48xf32>, vector<48x64xf32>, vector<16x64xf32> -> vector<16x64xf32>
    %137 = arith.addf %128, %136 : vector<16x64xf32>
    %cst_62 = arith.constant 1.500000e+01 : f32
    %138 = vector.broadcast %cst_62 : f32 to vector<16x1xf32>
    %139 = arith.cmpf oeq, %1, %138 : vector<16x1xf32>
    %cst_63 = arith.constant 0.000000e+00 : f32
    %140 = vector.shape_cast %139 : vector<16x1xi1> to vector<16x1xi1>
    %141 = vector.broadcast %140 : vector<16x1xi1> to vector<16x48xi1>
    %142 = vector.broadcast %cst_63 : f32 to vector<16x48xf32>
    %143 = arith.select %141, %0, %142 : vector<16x48xi1>, vector<16x48xf32>
    %c720 = arith.constant 720 : index
    %c0_64 = arith.constant 0 : index
    %144 = vector.load %arg2[%c720, %c0_64] : memref<1008x64xf32, #tpu.memory_space<vmem>>, vector<48x64xf32>
    %cst_65 = arith.constant dense<0.000000e+00> : vector<16x64xf32>
    %145 = tpu.matmul %143, %144, %cst_65 {dimension_numbers = #tpu.dot_dimension_numbers<[1], [0], [0], [1], [0, 0, 1, 1], [], []>} : vector<16x48xf32>, vector<48x64xf32>, vector<16x64xf32> -> vector<16x64xf32>
    %146 = arith.addf %137, %145 : vector<16x64xf32>
    %cst_66 = arith.constant 1.600000e+01 : f32
    %147 = vector.broadcast %cst_66 : f32 to vector<16x1xf32>
    %148 = arith.cmpf oeq, %1, %147 : vector<16x1xf32>
    %cst_67 = arith.constant 0.000000e+00 : f32
    %149 = vector.shape_cast %148 : vector<16x1xi1> to vector<16x1xi1>
    %150 = vector.broadcast %149 : vector<16x1xi1> to vector<16x48xi1>
    %151 = vector.broadcast %cst_67 : f32 to vector<16x48xf32>
    %152 = arith.select %150, %0, %151 : vector<16x48xi1>, vector<16x48xf32>
    %c768 = arith.constant 768 : index
    %c0_68 = arith.constant 0 : index
    %153 = vector.load %arg2[%c768, %c0_68] : memref<1008x64xf32, #tpu.memory_space<vmem>>, vector<48x64xf32>
    %cst_69 = arith.constant dense<0.000000e+00> : vector<16x64xf32>
    %154 = tpu.matmul %152, %153, %cst_69 {dimension_numbers = #tpu.dot_dimension_numbers<[1], [0], [0], [1], [0, 0, 1, 1], [], []>} : vector<16x48xf32>, vector<48x64xf32>, vector<16x64xf32> -> vector<16x64xf32>
    %155 = arith.addf %146, %154 : vector<16x64xf32>
    %cst_70 = arith.constant 1.700000e+01 : f32
    %156 = vector.broadcast %cst_70 : f32 to vector<16x1xf32>
    %157 = arith.cmpf oeq, %1, %156 : vector<16x1xf32>
    %cst_71 = arith.constant 0.000000e+00 : f32
    %158 = vector.shape_cast %157 : vector<16x1xi1> to vector<16x1xi1>
    %159 = vector.broadcast %158 : vector<16x1xi1> to vector<16x48xi1>
    %160 = vector.broadcast %cst_71 : f32 to vector<16x48xf32>
    %161 = arith.select %159, %0, %160 : vector<16x48xi1>, vector<16x48xf32>
    %c816 = arith.constant 816 : index
    %c0_72 = arith.constant 0 : index
    %162 = vector.load %arg2[%c816, %c0_72] : memref<1008x64xf32, #tpu.memory_space<vmem>>, vector<48x64xf32>
    %cst_73 = arith.constant dense<0.000000e+00> : vector<16x64xf32>
    %163 = tpu.matmul %161, %162, %cst_73 {dimension_numbers = #tpu.dot_dimension_numbers<[1], [0], [0], [1], [0, 0, 1, 1], [], []>} : vector<16x48xf32>, vector<48x64xf32>, vector<16x64xf32> -> vector<16x64xf32>
    %164 = arith.addf %155, %163 : vector<16x64xf32>
    %cst_74 = arith.constant 1.800000e+01 : f32
    %165 = vector.broadcast %cst_74 : f32 to vector<16x1xf32>
    %166 = arith.cmpf oeq, %1, %165 : vector<16x1xf32>
    %cst_75 = arith.constant 0.000000e+00 : f32
    %167 = vector.shape_cast %166 : vector<16x1xi1> to vector<16x1xi1>
    %168 = vector.broadcast %167 : vector<16x1xi1> to vector<16x48xi1>
    %169 = vector.broadcast %cst_75 : f32 to vector<16x48xf32>
    %170 = arith.select %168, %0, %169 : vector<16x48xi1>, vector<16x48xf32>
    %c864 = arith.constant 864 : index
    %c0_76 = arith.constant 0 : index
    %171 = vector.load %arg2[%c864, %c0_76] : memref<1008x64xf32, #tpu.memory_space<vmem>>, vector<48x64xf32>
    %cst_77 = arith.constant dense<0.000000e+00> : vector<16x64xf32>
    %172 = tpu.matmul %170, %171, %cst_77 {dimension_numbers = #tpu.dot_dimension_numbers<[1], [0], [0], [1], [0, 0, 1, 1], [], []>} : vector<16x48xf32>, vector<48x64xf32>, vector<16x64xf32> -> vector<16x64xf32>
    %173 = arith.addf %164, %172 : vector<16x64xf32>
    %cst_78 = arith.constant 1.900000e+01 : f32
    %174 = vector.broadcast %cst_78 : f32 to vector<16x1xf32>
    %175 = arith.cmpf oeq, %1, %174 : vector<16x1xf32>
    %cst_79 = arith.constant 0.000000e+00 : f32
    %176 = vector.shape_cast %175 : vector<16x1xi1> to vector<16x1xi1>
    %177 = vector.broadcast %176 : vector<16x1xi1> to vector<16x48xi1>
    %178 = vector.broadcast %cst_79 : f32 to vector<16x48xf32>
    %179 = arith.select %177, %0, %178 : vector<16x48xi1>, vector<16x48xf32>
    %c912 = arith.constant 912 : index
    %c0_80 = arith.constant 0 : index
    %180 = vector.load %arg2[%c912, %c0_80] : memref<1008x64xf32, #tpu.memory_space<vmem>>, vector<48x64xf32>
    %cst_81 = arith.constant dense<0.000000e+00> : vector<16x64xf32>
    %181 = tpu.matmul %179, %180, %cst_81 {dimension_numbers = #tpu.dot_dimension_numbers<[1], [0], [0], [1], [0, 0, 1, 1], [], []>} : vector<16x48xf32>, vector<48x64xf32>, vector<16x64xf32> -> vector<16x64xf32>
    %182 = arith.addf %173, %181 : vector<16x64xf32>
    %cst_82 = arith.constant 2.000000e+01 : f32
    %183 = vector.broadcast %cst_82 : f32 to vector<16x1xf32>
    %184 = arith.cmpf oeq, %1, %183 : vector<16x1xf32>
    %cst_83 = arith.constant 0.000000e+00 : f32
    %185 = vector.shape_cast %184 : vector<16x1xi1> to vector<16x1xi1>
    %186 = vector.broadcast %185 : vector<16x1xi1> to vector<16x48xi1>
    %187 = vector.broadcast %cst_83 : f32 to vector<16x48xf32>
    %188 = arith.select %186, %0, %187 : vector<16x48xi1>, vector<16x48xf32>
    %c960 = arith.constant 960 : index
    %c0_84 = arith.constant 0 : index
    %189 = vector.load %arg2[%c960, %c0_84] : memref<1008x64xf32, #tpu.memory_space<vmem>>, vector<48x64xf32>
    %cst_85 = arith.constant dense<0.000000e+00> : vector<16x64xf32>
    %190 = tpu.matmul %188, %189, %cst_85 {dimension_numbers = #tpu.dot_dimension_numbers<[1], [0], [0], [1], [0, 0, 1, 1], [], []>} : vector<16x48xf32>, vector<48x64xf32>, vector<16x64xf32> -> vector<16x64xf32>
    %191 = arith.addf %182, %190 : vector<16x64xf32>
    %c0_86 = arith.constant 0 : index
    %c0_87 = arith.constant 0 : index
    %192 = vector.load %arg3[%c0_86, %c0_87] : memref<1x64xf32, #tpu.memory_space<vmem>>, vector<1x64xf32>
    %193 = vector.broadcast %192 : vector<1x64xf32> to vector<16x64xf32>
    %194 = arith.addf %191, %193 : vector<16x64xf32>
    %cst_88 = arith.constant 0.000000e+00 : f32
    %195 = vector.broadcast %cst_88 : f32 to vector<16x64xf32>
    %196 = arith.maximumf %194, %195 : vector<16x64xf32>
    %c0_89 = arith.constant 0 : index
    %c0_90 = arith.constant 0 : index
    %197 = vector.load %arg4[%c0_89, %c0_90] : memref<64x32xf32, #tpu.memory_space<vmem>>, vector<64x32xf32>
    %cst_91 = arith.constant dense<0.000000e+00> : vector<16x32xf32>
    %198 = tpu.matmul %196, %197, %cst_91 {dimension_numbers = #tpu.dot_dimension_numbers<[1], [0], [0], [1], [0, 0, 1, 1], [], []>} : vector<16x64xf32>, vector<64x32xf32>, vector<16x32xf32> -> vector<16x32xf32>
    %c0_92 = arith.constant 0 : index
    %c0_93 = arith.constant 0 : index
    %199 = vector.load %arg5[%c0_92, %c0_93] : memref<1x32xf32, #tpu.memory_space<vmem>>, vector<1x32xf32>
    %200 = vector.broadcast %199 : vector<1x32xf32> to vector<16x32xf32>
    %201 = arith.addf %198, %200 : vector<16x32xf32>
    %cst_94 = arith.constant 0.000000e+00 : f32
    %202 = vector.broadcast %cst_94 : f32 to vector<16x32xf32>
    %203 = arith.maximumf %201, %202 : vector<16x32xf32>
    %c0_95 = arith.constant 0 : index
    %c0_96 = arith.constant 0 : index
    %204 = vector.load %arg6[%c0_95, %c0_96] : memref<32x32xf32, #tpu.memory_space<vmem>>, vector<32x32xf32>
    %cst_97 = arith.constant dense<0.000000e+00> : vector<16x32xf32>
    %205 = tpu.matmul %203, %204, %cst_97 {dimension_numbers = #tpu.dot_dimension_numbers<[1], [0], [0], [1], [0, 0, 1, 1], [], []>} : vector<16x32xf32>, vector<32x32xf32>, vector<16x32xf32> -> vector<16x32xf32>
    %c0_98 = arith.constant 0 : index
    %c0_99 = arith.constant 0 : index
    %206 = vector.load %arg7[%c0_98, %c0_99] : memref<1x32xf32, #tpu.memory_space<vmem>>, vector<1x32xf32>
    %207 = vector.broadcast %206 : vector<1x32xf32> to vector<16x32xf32>
    %208 = arith.addf %205, %207 : vector<16x32xf32>
    %cst_100 = arith.constant 0.000000e+00 : f32
    %209 = vector.broadcast %cst_100 : f32 to vector<16x32xf32>
    %210 = arith.maximumf %208, %209 : vector<16x32xf32>
    %c0_101 = arith.constant 0 : index
    %c0_102 = arith.constant 0 : index
    %211 = vector.load %arg8[%c0_101, %c0_102] : memref<32x32xf32, #tpu.memory_space<vmem>>, vector<32x32xf32>
    %cst_103 = arith.constant dense<0.000000e+00> : vector<16x32xf32>
    %212 = tpu.matmul %210, %211, %cst_103 {dimension_numbers = #tpu.dot_dimension_numbers<[1], [0], [0], [1], [0, 0, 1, 1], [], []>} : vector<16x32xf32>, vector<32x32xf32>, vector<16x32xf32> -> vector<16x32xf32>
    %c0_104 = arith.constant 0 : index
    %c0_105 = arith.constant 0 : index
    %213 = vector.load %arg9[%c0_104, %c0_105] : memref<1x32xf32, #tpu.memory_space<vmem>>, vector<1x32xf32>
    %214 = vector.broadcast %213 : vector<1x32xf32> to vector<16x32xf32>
    %215 = arith.addf %212, %214 : vector<16x32xf32>
    %c0_106 = arith.constant 0 : index
    %c0_107 = arith.constant 0 : index
    %216 = vector.load %arg10[%c0_106, %c0_107] : memref<16x32xf32, #tpu.memory_space<vmem>>, vector<16x32xf32>
    tpu.vector_store %arg10[%c0_106, %c0_107], %215 {strides = array<i32>} : memref<16x32xf32, #tpu.memory_space<vmem>>, vector<16x32xf32>,
    return
  }
  func.func @transform_0(%arg0: i32) -> (i32, i32) {
    %c0_i32 = arith.constant 0 : i32
    %c0_i32_0 = arith.constant 0 : i32
    return %arg0, %c0_i32 : i32, i32
  }
  func.func @transform_1(%arg0: i32) -> (i32, i32) {
    %c0_i32 = arith.constant 0 : i32
    %c0_i32_0 = arith.constant 0 : i32
    %c0_i32_1 = arith.constant 0 : i32
    return %c0_i32, %c0_i32_0 : i32, i32
  }
  func.func @transform_2(%arg0: i32) -> (i32, i32) {
    %c0_i32 = arith.constant 0 : i32
    %c0_i32_0 = arith.constant 0 : i32
    %c0_i32_1 = arith.constant 0 : i32
    return %c0_i32, %c0_i32_0 : i32, i32
  }
  func.func @transform_3(%arg0: i32) -> (i32, i32) {
    %c0_i32 = arith.constant 0 : i32
    %c0_i32_0 = arith.constant 0 : i32
    %c0_i32_1 = arith.constant 0 : i32
    return %c0_i32, %c0_i32_0 : i32, i32
  }
  func.func @transform_4(%arg0: i32) -> (i32, i32) {
    %c0_i32 = arith.constant 0 : i32
    %c0_i32_0 = arith.constant 0 : i32
    %c0_i32_1 = arith.constant 0 : i32
    return %c0_i32, %c0_i32_0 : i32, i32
  }
  func.func @transform_5(%arg0: i32) -> (i32, i32) {
    %c0_i32 = arith.constant 0 : i32
    %c0_i32_0 = arith.constant 0 : i32
    %c0_i32_1 = arith.constant 0 : i32
    return %c0_i32, %c0_i32_0 : i32, i32
  }
  func.func @transform_6(%arg0: i32) -> (i32, i32) {
    %c0_i32 = arith.constant 0 : i32
    %c0_i32_0 = arith.constant 0 : i32
    %c0_i32_1 = arith.constant 0 : i32
    return %c0_i32, %c0_i32_0 : i32, i32
  }
  func.func @transform_7(%arg0: i32) -> (i32, i32) {
    %c0_i32 = arith.constant 0 : i32
    %c0_i32_0 = arith.constant 0 : i32
    %c0_i32_1 = arith.constant 0 : i32
    return %c0_i32, %c0_i32_0 : i32, i32
  }
  func.func @transform_8(%arg0: i32) -> (i32, i32) {
    %c0_i32 = arith.constant 0 : i32
    %c0_i32_0 = arith.constant 0 : i32
    %c0_i32_1 = arith.constant 0 : i32
    return %c0_i32, %c0_i32_0 : i32, i32
  }
  func.func @transform_9(%arg0: i32) -> (i32, i32) {
    %c0_i32 = arith.constant 0 : i32
    %c0_i32_0 = arith.constant 0 : i32
    return %arg0, %c0_i32 : i32, i32
  }
}

</mosaic_0001>

<bundles_post_ra>
// kernel: per_residue_encoder.1
= control target key start
LH: loop header
LB: loop body
LE: loop exit
PB: predicated region body
PF: predicated region fallthrough
CT: control target
= control target key end

     0   :  { %v1340_v2 = vmov 42   ;;  %v1341_v3 = vmov 0   ;;  %s2029_s0 = inlined_call_operand.vmem [shape: f32[16,48], index: 0, kind: input, shape index: {}]   ;;  %s2030_s1 = inlined_call_operand.vmem [shape: f32[1008,64], index: 1, kind: input, shape index: {}]   ;;  %s2031_s2 = inlined_call_operand.vmem [shape: f32[1,64], index: 2, kind: input, shape index: {}]   ;;  %s2032_s3 = inlined_call_operand.vmem [shape: f32[64,32], index: 3, kind: input, shape index: {}]   ;;  %s2033_s4 = inlined_call_operand.vmem [shape: f32[1,32], index: 4, kind: input, shape index: {}]   ;;  %s2034_s5 = inlined_call_operand.vmem [shape: f32[32,32], index: 5, kind: input, shape index: {}]   ;;  %s2035_s6 = inlined_call_operand.vmem [shape: f32[1,32], index: 6, kind: input, shape index: {}]   ;;  %s2036_s7 = inlined_call_operand.vmem [shape: f32[32,32], index: 7, kind: input, shape index: {}]   ;;  %s2037_s8 = inlined_call_operand.vmem [shape: f32[1,32], index: 8, kind: input, shape index: {}]   ;;  %s2038_s9 = inlined_call_operand.hbm [shape: f32[16,32], index: 9, kind: output, shape index: {}]  }
   0x1   :  { %v1398_v0 = vld [vmem:[%s2029_s0 + $0x8] sm:$0xff]  ;;  %v1403_v1 = vld [vmem:[%s2029_s0] sm:$0xff]  ;;  %1307 = vset.pattern.permute.xlu2 %v1340_v2  ;;  %1306 = vset.pattern.permute.xlu1 %v1340_v2 }
   0x2   :  { %vm56_vm0 = vcmp.eq.f32.partialorder %v1398_v0, 1.0  ;;  %vm55_vm1 = vcmp.eq.f32.partialorder %v1403_v1, 1.0  ;;  %vm35_vm2 = vcmp.eq.f32.partialorder %v1403_v1, 0.0  ;;  %1305 = vset.pattern.permute.xlu0 %v1340_v2 }
   0x3   :  { %v58_v4 = vsel %vm56_vm0, 1, %v1341_v3  ;;  %v57_v5 = vsel %vm55_vm1, 1, %v1341_v3  ;;  %v37_v6 = vsel %vm35_vm2, 1, %v1341_v3 }
   0x4   :  { %63 = vperm.xlu1 %1306, %v58_v4   ;;  %60 = vperm.xlu0 %1305, %v57_v5  }
   0x5   :  { %40 = vperm.xlu2 %1307, %v37_v6  }
   0x6   :  { %14 = vsyncpa [#allocation3], 0  ;;  %vm185_vm3 = vcmp.eq.f32.partialorder %v1403_v1, 3.0  ;;  %vm134_vm4 = vcmp.eq.f32.partialorder %v1403_v1, 2.0  ;;  %vm135_vm5 = vcmp.eq.f32.partialorder %v1398_v0, 2.0  ;;  %vm236_vm6 = vcmp.eq.f32.partialorder %v1403_v1, 4.0 }
   0x7   :  { %v187_v7 = vsel %vm185_vm3, 1, %v1341_v3  ;;  %v136_v8 = vsel %vm134_vm4, 1, %v1341_v3  ;;  %v137_v9 = vsel %vm135_vm5, 1, %v1341_v3  ;;  %vm186_vm7 = vcmp.eq.f32.partialorder %v1398_v0, 3.0  ;;  %v74_v34 = vld [vmem:[%s2030_s1 + $0x58] sm:$0xff]  ;;  %v54_v35 = vld [vmem:[%s2030_s1 + $0x28] sm:$0xff] }
   0x8   :  { %vm36_vm8 = vcmp.eq.f32.partialorder %v1398_v0, 0.0  ;;  %v238_v10 = vsel %vm236_vm6, 1, %v1341_v3  ;;  %v188_v11 = vsel %vm186_vm7, 1, %v1341_v3  ;;  %vm237_vm9 = vcmp.eq.f32.partialorder %v1398_v0, 4.0  ;;  %92 = vmatpush.msra.mxu0 %v74_v34  ;;  %121 = vmatpush.msra.mxu1 %v54_v35  ;;  %v73_v36 = vld [vmem:[%s2030_s1 + $0x50] sm:$0xff]  ;;  %v53_v37 = vld [vmem:[%s2030_s1 + $0x20] sm:$0xff] }
   0x9   :  { %v38_v12 = vsel %vm36_vm8, 1, %v1341_v3  ;;  %vm338_vm10 = vcmp.eq.f32.partialorder %v1403_v1, 6.0  ;;  %vm389_vm11 = vcmp.eq.f32.partialorder %v1403_v1, 7.0  ;;  %v239_v13 = vsel %vm237_vm9, 1, %v1341_v3  ;;  %v72_v40 = vld [vmem:[%s2030_s1 + $0x48] sm:$0xff]  ;;  %v52_v41 = vld [vmem:[%s2030_s1 + $0x18] sm:$0xff] }
   0xa   :  { %v340_v14 = vsel %vm338_vm10, 1, %v1341_v3  ;;  %v391_v15 = vsel %vm389_vm11, 1, %v1341_v3  ;;  %vm339_vm12 = vcmp.eq.f32.partialorder %v1398_v0, 6.0  ;;  %vm287_vm13 = vcmp.eq.f32.partialorder %v1403_v1, 5.0  ;;  %93 = vmatpush.msra.mxu0 %v73_v36  ;;  %122 = vmatpush.msra.mxu1 %v53_v37  ;;  %v71_v43 = vld [vmem:[%s2030_s1 + $0x40] sm:$0xff]  ;;  %v51_v44 = vld [vmem:[%s2030_s1 + $0x10] sm:$0xff] }
   0xb   :  { %vm390_vm14 = vcmp.eq.f32.partialorder %v1398_v0, 7.0  ;;  %v341_v16 = vsel %vm339_vm12, 1, %v1341_v3  ;;  %v289_v17 = vsel %vm287_vm13, 1, %v1341_v3  ;;  %vm288_vm15 = vcmp.eq.f32.partialorder %v1398_v0, 5.0  ;;  %v153_v45 = vld [vmem:[%s2030_s1 + $0x88] sm:$0xff]  ;;  %v70_v46 = vld [vmem:[%s2030_s1 + $0x38] sm:$0xff] }
   0xc   :  { %190 = vperm.xlu1 %1306, %v187_v7   ;;  %139 = vperm.xlu0 %1305, %v136_v8   ;;  %v392_v18 = vsel %vm390_vm14, 1, %v1341_v3  ;;  %vm440_vm0 = vcmp.eq.f32.partialorder %v1403_v1, 8.0  ;;  %vm542_vm1 = vcmp.eq.f32.partialorder %v1403_v1, 10.0  ;;  %v290_v19 = vsel %vm288_vm15, 1, %v1341_v3  ;;  %v204_v47 = vld [vmem:[%s2030_s1 + $0xb8] sm:$0xff]  ;;  %v50_v48 = vld [vmem:[%s2030_s1 + $0x8] sm:$0xff] }
   0xd   :  { %142 = vperm.xlu2 %1307, %v137_v9   ;;  %v442_v20 = vsel %vm440_vm0, 1, %v1341_v3  ;;  %v544_v21 = vsel %vm542_vm1, 1, %v1341_v3  ;;  %vm593_vm2 = vcmp.eq.f32.partialorder %v1403_v1, 11.0  ;;  %vm441_vm3 = vcmp.eq.f32.partialorder %v1398_v0, 8.0  ;;  %94 = vmatpush.msra.mxu0 %v72_v40  ;;  %v69_v49 = vld [vmem:[%s2030_s1 + $0x30] sm:$0xff]  ;;  %v49_v50 = vld [vmem:[%s2030_s1] sm:$0xff] }
   0xe   :  { %vm491_vm4 = vcmp.eq.f32.partialorder %v1403_v1, 9.0  ;;  %v595_v22 = vsel %vm593_vm2, 1, %v1341_v3  ;;  %v443_v23 = vsel %vm441_vm3, 1, %v1341_v3  ;;  %vm594_vm5 = vcmp.eq.f32.partialorder %v1398_v0, 11.0  ;;  %123 = vmatpush.msra.mxu1 %v52_v41  ;;  %170 = vmatpush.msra.mxu2 %v153_v45  ;;  %v152_v51 = vld [vmem:[%s2030_s1 + $0x80] sm:$0xff]  ;;  %v203_v54 = vld [vmem:[%s2030_s1 + $0xb0] sm:$0xff] }
   0xf   :  { %v493_v24 = vsel %vm491_vm4, 1, %v1341_v3  ;;  %vm543_vm6 = vcmp.eq.f32.partialorder %v1398_v0, 10.0  ;;  %vm644_vm7 = vcmp.eq.f32.partialorder %v1403_v1, 12.0  ;;  %v596_v25 = vsel %vm594_vm5, 1, %v1341_v3  ;;  %95 = vmatpush.msra.mxu0 %v71_v43  ;;  %221 = vmatpush.msra.mxu3 %v204_v47  ;;  %v151_v55 = vld [vmem:[%s2030_s1 + $0x78] sm:$0xff]  ;;  %v202_v57 = vld [vmem:[%s2030_s1 + $0xa8] sm:$0xff] }
  0x10   :  { %v545_v26 = vsel %vm543_vm6, 1, %v1341_v3  ;;  %v646_v27 = vsel %vm644_vm7, 1, %v1341_v3  ;;  %vm746_vm8 = vcmp.eq.f32.partialorder %v1403_v1, 14.0  ;;  %vm492_vm9 = vcmp.eq.f32.partialorder %v1398_v0, 9.0  ;;  %124 = vmatpush.msra.mxu1 %v51_v44  ;;  %171 = vmatpush.msra.mxu2 %v152_v51  ;;  %v150_v58 = vld [vmem:[%s2030_s1 + $0x70] sm:$0xff]  ;;  %v255_v59 = vld [vmem:[%s2030_s1 + $0xe8] sm:$0xff] }
  0x11   :  { %vm645_vm10 = vcmp.eq.f32.partialorder %v1398_v0, 12.0  ;;  %v748_v28 = vsel %vm746_vm8, 1, %v1341_v3  ;;  %v494_v29 = vsel %vm492_vm9, 1, %v1341_v3  ;;  %vm695_vm11 = vcmp.eq.f32.partialorder %v1403_v1, 13.0  ;;  %96 = vmatpush.msra.mxu0 %v70_v46  ;;  %222 = vmatpush.msra.mxu3 %v203_v54  ;;  %v201_v60 = vld [vmem:[%s2030_s1 + $0xa0] sm:$0xff]  ;;  %v149_v61 = vld [vmem:[%s2030_s1 + $0x68] sm:$0xff] }
  0x12   :  { %v647_v30 = vsel %vm645_vm10, 1, %v1341_v3  ;;  %vm797_vm12 = vcmp.eq.f32.partialorder %v1403_v1, 15.0  ;;  %vm747_vm13 = vcmp.eq.f32.partialorder %v1398_v0, 14.0  ;;  %v697_v31 = vsel %vm695_vm11, 1, %v1341_v3  ;;  %125 = vmatpush.msra.mxu1 %v50_v48  ;;  %172 = vmatpush.msra.mxu2 %v151_v55  ;;  %v200_v62 = vld [vmem:[%s2030_s1 + $0x98] sm:$0xff]  ;;  %v148_v2 = vld [vmem:[%s2030_s1 + $0x60] sm:$0xff] }
  0x13   :  { %v799_v32 = vsel %vm797_vm12, 1, %v1341_v3  ;;  %v749_v33 = vsel %vm747_vm13, 1, %v1341_v3  ;;  %vm848_vm14 = vcmp.eq.f32.partialorder %v1403_v1, 16.0  ;;  %vm798_vm15 = vcmp.eq.f32.partialorder %v1398_v0, 15.0  ;;  %97 = vmatpush.msra.mxu0 %v69_v49  ;;  %223 = vmatpush.msra.mxu3 %v202_v57  ;;  %v199_v4 = vld [vmem:[%s2030_s1 + $0x90] sm:$0xff]  ;;  %v254_v5 = vld [vmem:[%s2030_s1 + $0xe0] sm:$0xff] }
  0x14   :  { %241 = vperm.xlu1 %1306, %v238_v10   ;;  %193 = vperm.xlu0 %1305, %v188_v11   ;;  %vm696_vm0 = vcmp.eq.f32.partialorder %v1398_v0, 13.0  ;;  %v850_v38 = vsel %vm848_vm14, 1, %v1341_v3  ;;  %v800_v39 = vsel %vm798_vm15, 1, %v1341_v3  ;;  %vm849_vm1 = vcmp.eq.f32.partialorder %v1398_v0, 16.0  ;;  %v253_v10 = vld [vmem:[%s2030_s1 + $0xd8] sm:$0xff]  ;;  %v252_v11 = vld [vmem:[%s2030_s1 + $0xd0] sm:$0xff] }
  0x15   :  { %43 = vperm.xlu2 %1307, %v38_v12   ;;  %v698_v42 = vsel %vm696_vm0, 1, %v1341_v3  ;;  %vm950_vm2 = vcmp.eq.f32.partialorder %v1403_v1, 18.0  ;;  %vm1001_vm3 = vcmp.eq.f32.partialorder %v1403_v1, 19.0  ;;  %v851_v52 = vsel %vm849_vm1, 1, %v1341_v3  ;;  %126 = vmatpush.msra.mxu1 %v49_v50  ;;  %v357_v12 = vld [vmem:[%s2030_s1 + $0x148] sm:$0xff]  ;;  %v303_v34 = vld [vmem:[%s2030_s1 + $0x100] sm:$0xff] }
  0x16   :  { %v952_v53 = vsel %vm950_vm2, 1, %v1341_v3  ;;  %v1003_v56 = vsel %vm1001_vm3, 1, %v1341_v3  ;;  %vm951_vm4 = vcmp.eq.f32.partialorder %v1398_v0, 18.0  ;;  %vm899_vm5 = vcmp.eq.f32.partialorder %v1403_v1, 17.0  ;;  %173 = vmatpush.msra.mxu2 %v150_v58  ;;  %272 = vmatpush.msrb.mxu0 %v255_v59  ;;  %v302_v35 = vld [vmem:[%s2030_s1 + $0xf8] sm:$0xff]  ;;  %v301_v40 = vld [vmem:[%s2030_s1 + $0xf0] sm:$0xff] }
  0x17   :  { %vm1002_vm6 = vcmp.eq.f32.partialorder %v1398_v0, 19.0  ;;  %vm75_vm7 = vcmask 392192   ;;  %224 = vmatpush.msra.mxu3 %v201_v60  ;;  %v953_v7 = vsel %vm951_vm4, 1, %v1341_v3  ;;  %v901_v8 = vsel %vm899_vm5, 1, %v1341_v3  ;;  %v457_v43 = vld [vmem:[%s2030_s1 + $0x198] sm:$0xff]  ;;  %v456_v44 = vld [vmem:[%s2030_s1 + $0x190] sm:$0xff] }
  0x18   :  { %174 = vmatpush.msra.mxu2 %v149_v61  ;;  %273 = vmatpush.msrb.mxu0 %v254_v5  ;;  %v1004_v9 = vsel %vm1002_vm6, 1, %v1341_v3  ;;  %vm900_vm9 = vcmp.eq.f32.partialorder %v1398_v0, 17.0  ;;  %vm1052_vm10 = vcmp.eq.f32.partialorder %v1403_v1, 20.0  ;;  %vm1053_vm11 = vcmp.eq.f32.partialorder %v1398_v0, 20.0  ;;  %v510_v47 = vld [vmem:[%s2030_s1 + $0x1d8] sm:$0xff]  ;;  %v561_v48 = vld [vmem:[%s2030_s1 + $0x208] sm:$0xff] }
  0x19   :  { %225 = vmatpush.msra.mxu3 %v200_v62  ;;  %v560_v54 = vld [vmem:[%s2030_s1 + $0x200] sm:$0xff]  ;;  %v509_v55 = vld [vmem:[%s2030_s1 + $0x1d0] sm:$0xff]  ;;  %v559_v59 = vld [vmem:[%s2030_s1 + $0x1f8] sm:$0xff]  ;;  %s1240_s30 = sshll.u32 %s2038_s9, 4  ;;  %s1343_s10 = smov 128   ;;  %s1241_s30 = int_to_ptr.hbm [resolvable:$true] %s1240_s30 }
  0x1a   :  { %175 = vmatpush.msra.mxu2 %v148_v2  ;;  %274 = vmatpush.msrb.mxu0 %v253_v10  ;;  %v611_v57 = vld [vmem:[%s2030_s1 + $0x230] sm:$0xff]  ;;  %v508_v60 = vld [vmem:[%s2030_s1 + $0x1c8] sm:$0xff]  ;;  %s1344_s11 = smov 8  }
  0x1b   :  { %226 = vmatpush.msra.mxu3 %v199_v4  ;;  %v610_v61 = vld [vmem:[%s2030_s1 + $0x228] sm:$0xff]  ;;  %v558_v62 = vld [vmem:[%s2030_s1 + $0x1f0] sm:$0xff] }
  0x1c   :  { %244 = vperm.xlu1 %1306, %v239_v13   ;;  %343 = vperm.xlu0 %1305, %v340_v14   ;;  %v408_v13 = vld [vmem:[%s2030_s1 + $0x178] sm:$0xff]  ;;  %v251_v14 = vld [vmem:[%s2030_s1 + $0xc8] sm:$0xff] }
  0x1d   :  { %394 = vperm.xlu2 %1307, %v391_v15   ;;  %275 = vmatpush.msrb.mxu0 %v252_v11  ;;  %v557_v5 = vld [vmem:[%s2030_s1 + $0x1e8] sm:$0xff]  ;;  %v556_v11 = vld [vmem:[%s2030_s1 + $0x1e0] sm:$0xff] }
  0x1e   :  { %374 = vmatpush.msrb.mxu2 %v357_v12  ;;  %425 = vmatpush.msrb.mxu3 %v408_v13  ;;  %v663_v10 = vld [vmem:[%s2030_s1 + $0x268] sm:$0xff]  ;;  %v506_v12 = vld [vmem:[%s2030_s1 + $0x1b8] sm:$0xff] }
  0x1f   :  { %276 = vmatpush.msrb.mxu0 %v251_v14  ;;  %v608_v13 = vld [vmem:[%s2030_s1 + $0x218] sm:$0xff]  ;;  %v662_v14 = vld [vmem:[%s2030_s1 + $0x260] sm:$0xff] }
  0x24   :  { %346 = vperm.xlu1 %1306, %v341_v16   ;;  %292 = vperm.xlu0 %1305, %v289_v17   ;;  %v250_v16 = vld [vmem:[%s2030_s1 + $0xc0] sm:$0xff] }
  0x25   :  { %397 = vperm.xlu2 %1307, %v392_v18   ;;  %v356_v17 = vld [vmem:[%s2030_s1 + $0x140] sm:$0xff]  ;;  %v407_v18 = vld [vmem:[%s2030_s1 + $0x170] sm:$0xff]  ;;  %277 = vmatpush.msrb.mxu0 %v250_v16 }
  0x26   :  { %375 = vmatpush.msrb.mxu2 %v356_v17  ;;  %426 = vmatpush.msrb.mxu3 %v407_v18  ;;  %v607_v16 = vld [vmem:[%s2030_s1 + $0x210] sm:$0xff]  ;;  %v661_v17 = vld [vmem:[%s2030_s1 + $0x258] sm:$0xff] }
  0x2c   :  { %295 = vperm.xlu1 %1306, %v290_v19   ;;  %445 = vperm.xlu0 %1305, %v442_v20   ;;  %v902_v19 = vsel %vm900_vm9, 1, %v1341_v3  ;;  %v1054_v20 = vsel %vm1052_vm10, 1, %v1341_v3 }
  0x2d   :  { %547 = vperm.xlu2 %1307, %v544_v21   ;;  %v1055_v21 = vsel %vm1053_vm11, 1, %v1341_v3  ;;  %v405_v3 = vld [vmem:[%s2030_s1 + $0x160] sm:$0xff] }
  0x34   :  { %598 = vperm.xlu1 %1306, %v595_v22   ;;  %448 = vperm.xlu0 %1305, %v443_v23   ;;  %v355_v22 = vld [vmem:[%s2030_s1 + $0x138] sm:$0xff]  ;;  %v406_v23 = vld [vmem:[%s2030_s1 + $0x168] sm:$0xff] }
  0x35   :  { %496 = vperm.xlu2 %1307, %v493_v24   ;;  %376 = vmatpush.msrb.mxu2 %v355_v22  ;;  %v354_v24 = vld [vmem:[%s2030_s1 + $0x130] sm:$0xff] }
  0x36   :  { %427 = vmatpush.msrb.mxu3 %v406_v23 }
  0x37   :  { %377 = vmatpush.msrb.mxu2 %v354_v24  ;;  %v765_v24 = vld [vmem:[%s2030_s1 + $0x2c8] sm:$0xff] }
  0x38   :  { %428 = vmatpush.msrb.mxu3 %v405_v3  ;;  %v659_v3 = vld [vmem:[%s2030_s1 + $0x248] sm:$0xff] }
  0x3c   :  { %601 = vperm.xlu1 %1306, %v596_v25   ;;  %550 = vperm.xlu0 %1305, %v545_v26   ;;  %v306_v25 = vld [vmem:[%s2030_s1 + $0x118] sm:$0xff]  ;;  %v353_v26 = vld [vmem:[%s2030_s1 + $0x128] sm:$0xff] }
  0x3d   :  { %649 = vperm.xlu2 %1307, %v646_v27   ;;  %323 = vmatpush.msrb.mxu1 %v306_v25  ;;  %v404_v27 = vld [vmem:[%s2030_s1 + $0x158] sm:$0xff] }
  0x3e   :  { %378 = vmatpush.msrb.mxu2 %v353_v26  ;;  %429 = vmatpush.msrb.mxu3 %v404_v27  ;;  %v764_v26 = vld [vmem:[%s2030_s1 + $0x2c0] sm:$0xff] }
  0x3f   :  { %v658_v27 = vld [vmem:[%s2030_s1 + $0x240] sm:$0xff] }
  0x44   :  { %751 = vperm.xlu1 %1306, %v748_v28   ;;  %499 = vperm.xlu0 %1305, %v494_v29   ;;  %v305_v29 = vld [vmem:[%s2030_s1 + $0x110] sm:$0xff] }
  0x45   :  { %652 = vperm.xlu2 %1307, %v647_v30   ;;  %v352_v30 = vld [vmem:[%s2030_s1 + $0x120] sm:$0xff]  ;;  %324 = vmatpush.msrb.mxu1 %v305_v29 }
  0x46   :  { %379 = vmatpush.msrb.mxu2 %v352_v30 }
  0x4c   :  { %700 = vperm.xlu1 %1306, %v697_v31   ;;  %802 = vperm.xlu0 %1305, %v799_v32   ;;  %v403_v31 = vld [vmem:[%s2030_s1 + $0x150] sm:$0xff] }
  0x4d   :  { %754 = vperm.xlu2 %1307, %v749_v33   ;;  %v304_v33 = vld [vmem:[%s2030_s1 + $0x108] sm:$0xff]  ;;  %430 = vmatpush.msrb.mxu3 %v403_v31  ;;  %v816_v31 = vld [vmem:[%s2030_s1 + $0x2f8] sm:$0xff] }
  0x4e   :  { %325 = vmatpush.msrb.mxu1 %v304_v33  ;;  %v762_v33 = vld [vmem:[%s2030_s1 + $0x2b0] sm:$0xff] }
  0x50   :  { %326 = vmatpush.msrb.mxu1 %v303_v34 }
  0x52   :  { %327 = vmatpush.msrb.mxu1 %v302_v35 }
  0x54   :  { %853 = vperm.xlu1 %1306, %v850_v38   ;;  %805 = vperm.xlu0 %1305, %v800_v39   ;;  %v459_v38 = vld [vmem:[%s2030_s1 + $0x1a8] sm:$0xff] }
  0x55   :  { %703 = vperm.xlu2 %1307, %v698_v42   ;;  %328 = vmatpush.msrb.mxu1 %v301_v40  ;;  %v458_v42 = vld [vmem:[%s2030_s1 + $0x1a0] sm:$0xff]  ;;  %v713_v40 = vld [vmem:[%s2030_s1 + $0x290] sm:$0xff] }
  0x5c   :  { %856 = vperm.xlu1 %1306, %v851_v52   ;;  %955 = vperm.xlu0 %1305, %v952_v53   ;;  %v612_v52 = vld [vmem:[%s2030_s1 + $0x238] sm:$0xff]  ;;  %v455_v53 = vld [vmem:[%s2030_s1 + $0x188] sm:$0xff] }
  0x5d   :  { %1006 = vperm.xlu2 %1307, %v1003_v56   ;;  %v454_v56 = vld [vmem:[%s2030_s1 + $0x180] sm:$0xff] }
  0x5f   :  { %v41_v63 = vpop.permute.xlu2 %40 }
  0x60   :  { %vm45_vm8 = vcmp.eq.s32.totalorder %v41_v63, 1  ;;  %v507_v63 = vld [vmem:[%s2030_s1 + $0x1c0] sm:$0xff] }
  0x61   :  { %v47_v6 = vsel %vm45_vm8, %v1403_v1, 0.0 }
  0x62   :  { %1254 = vmatmul.msk.f32.vlgmr.msra.gmra.mxu1 %vm75_vm7, %v47_v6 }
  0x63   :  { %527 = vmatpush.msra.mxu1 %v510_v47  ;;  %v711_v47 = vld [vmem:[%s2030_s1 + $0x280] sm:$0xff] }
  0x64   :  { %958 = vperm.xlu1 %1306, %v953_v7   ;;  %904 = vperm.xlu0 %1305, %v901_v8  }
  0x65   :  { %1009 = vperm.xlu2 %1307, %v1004_v9   ;;  %528 = vmatpush.msra.mxu1 %v509_v55  ;;  %v609_v9 = vld [vmem:[%s2030_s1 + $0x220] sm:$0xff]  ;;  %v811_v55 = vld [vmem:[%s2030_s1 + $0x2d0] sm:$0xff] }
  0x67   :  { %v1580_v15 = vpop.permute.xlu2 %142  ;;  %529 = vmatpush.msra.mxu1 %v508_v60 }
  0x68   :  { %vm145_vm1 = vcmp.eq.s32.totalorder %v1580_v15, 1  ;;  %v505_v15 = vld [vmem:[%s2030_s1 + $0x1b0] sm:$0xff] }
  0x69   :  { %v147_v6 = vsel %vm145_vm1, %v1398_v0, 0.0  ;;  %530 = vmatpush.msra.mxu1 %v507_v63 }
  0x6b   :  { %531 = vmatpush.msra.mxu1 %v506_v12  ;;  %v862_v12 = vld [vmem:[%s2030_s1 + $0x300] sm:$0xff] }
  0x6c   :  { %907 = vperm.xlu1 %1306, %v902_v19   ;;  %1057 = vperm.xlu0 %1305, %v1054_v20  }
  0x6d   :  { %1060 = vperm.xlu2 %1307, %v1055_v21   ;;  %532 = vmatpush.msra.mxu1 %v505_v15  ;;  %v660_v21 = vld [vmem:[%s2030_s1 + $0x250] sm:$0xff] }
  0x6f   :  { %v44_v28 = vpop.permute.xlu2 %43 }
  0x70   :  { %vm46_vm12 = vcmp.eq.s32.totalorder %v44_v28, 1  ;;  %v763_v28 = vld [vmem:[%s2030_s1 + $0x2b8] sm:$0xff] }
  0x71   :  { %v48_v32 = vsel %vm46_vm12, %v1398_v0, 0.0 }
  0x72   :  { %1255 = vmatmul.msk.f32.gmra.mxu1 %vm75_vm7, %v48_v32 }
  0x76   :  { %v64_v36 = vpop.permute.xlu1 %63  ;;  %v61_v37 = vpop.permute.xlu0 %60 }
  0x77   :  { %vm65_vm13 = vcmp.eq.s32.totalorder %v61_v37, 1  ;;  %v1643_v41 = vpop.permute.xlu2 %394  ;;  %vm66_vm14 = vcmp.eq.s32.totalorder %v64_v36, 1  ;;  %v714_v36 = vld [vmem:[%s2030_s1 + $0x298] sm:$0xff]  ;;  %v815_v37 = vld [vmem:[%s2030_s1 + $0x2f0] sm:$0xff] }
  0x78   :  { %v67_v39 = vsel %vm65_vm13, %v1403_v1, 0.0  ;;  %v68_v49 = vsel %vm66_vm14, %v1398_v0, 0.0  ;;  %vm399_vm4 = vcmp.eq.s32.totalorder %v1643_v41, 1  ;;  %v814_v41 = vld [vmem:[%s2030_s1 + $0x2e8] sm:$0xff] }
  0x79   :  { %1252 = vmatmul.msk.f32.vlgmr.msra.gmra.mxu0 %vm75_vm7, %v67_v39  ;;  %v401_v25 = vsel %vm399_vm4, %v1403_v1, 0.0  ;;  %v761_v39 = vld [vmem:[%s2030_s1 + $0x2a8] sm:$0xff] }
  0x7a   :  { %476 = vmatpush.msra.mxu0 %v459_v38 }
  0x7c   :  { %477 = vmatpush.msra.mxu0 %v458_v42  ;;  %v760_v42 = vld [vmem:[%s2030_s1 + $0x2a0] sm:$0xff] }
  0x7e   :  { %v191_v45 = vpop.permute.xlu1 %190  ;;  %v140_v46 = vpop.permute.xlu0 %139  ;;  %478 = vmatpush.msra.mxu0 %v457_v43  ;;  %v712_v43 = vld [vmem:[%s2030_s1 + $0x288] sm:$0xff] }
  0x7f   :  { %vm195_vm15 = vcmp.eq.s32.totalorder %v191_v45, 1  ;;  %vm144_vm0 = vcmp.eq.s32.totalorder %v140_v46, 1  ;;  %v1685_v58 = vpop.permute.xlu2 %397 }
  0x80   :  { %v197_v50 = vsel %vm195_vm15, %v1403_v1, 0.0  ;;  %v146_v51 = vsel %vm144_vm0, %v1403_v1, 0.0  ;;  %479 = vmatpush.msra.mxu0 %v456_v44  ;;  %vm400_vm8 = vcmp.eq.s32.totalorder %v1685_v58, 1  ;;  %v813_v44 = vld [vmem:[%s2030_s1 + $0x2e0] sm:$0xff]  ;;  %v865_v58 = vld [vmem:[%s2030_s1 + $0x318] sm:$0xff] }
  0x81   :  { %1253 = vmatmul.msk.f32.gmra.mxu0 %vm75_vm7, %v68_v49  ;;  %1256 = vmatmul.msk.f32.vlgmr.msra.gmra.mxu2 %vm75_vm7, %v146_v51  ;;  %v402_v38 = vsel %vm400_vm8, %v1398_v0, 0.0  ;;  %v812_v51 = vld [vmem:[%s2030_s1 + $0x2d8] sm:$0xff] }
  0x82   :  { %1258 = vmatmul.msk.f32.vlgmr.msra.gmra.mxu3 %vm75_vm7, %v197_v50  ;;  %578 = vmatpush.msra.mxu2 %v561_v48  ;;  %v867_v50 = vld [vmem:[%s2030_s1 + $0x328] sm:$0xff] }
  0x83   :  { %629 = vmatpush.msra.mxu3 %v612_v52  ;;  %480 = vmatpush.msra.mxu0 %v455_v53 }
  0x84   :  { %579 = vmatpush.msra.mxu2 %v560_v54  ;;  %v710_v54 = vld [vmem:[%s2030_s1 + $0x278] sm:$0xff] }
  0x85   :  { %481 = vmatpush.msra.mxu0 %v454_v56  ;;  %630 = vmatpush.msra.mxu3 %v611_v57  ;;  %v866_v56 = vld [vmem:[%s2030_s1 + $0x320] sm:$0xff]  ;;  %v709_v57 = vld [vmem:[%s2030_s1 + $0x270] sm:$0xff] }
  0x86   :  { %v242_v2 = vpop.permute.xlu1 %241  ;;  %v194_v4 = vpop.permute.xlu0 %193  ;;  %580 = vmatpush.msra.mxu2 %v559_v59 }
  0x87   :  { %vm246_vm2 = vcmp.eq.s32.totalorder %v242_v2, 1  ;;  %vm196_vm3 = vcmp.eq.s32.totalorder %v194_v4, 1  ;;  %631 = vmatpush.msra.mxu3 %v610_v61  ;;  %v1739_v18 = vpop.permute.xlu2 %547  ;;  %v969_v61 = vld [vmem:[%s2030_s1 + $0x388] sm:$0xff] }
  0x88   :  { %v248_v7 = vsel %vm246_vm2, %v1403_v1, 0.0  ;;  %v198_v8 = vsel %vm196_vm3, %v1398_v0, 0.0  ;;  %581 = vmatpush.msra.mxu2 %v558_v62  ;;  %vm552_vm11 = vcmp.eq.s32.totalorder %v1739_v18, 1  ;;  %v864_v62 = vld [vmem:[%s2030_s1 + $0x310] sm:$0xff] }
  0x89   :  { %1257 = vmatmul.msk.f32.gmra.mxu2 %vm75_vm7, %v147_v6  ;;  %1260 = vmatmul.msk.f32.vlgmr.msrb.gmra.mxu0 %vm75_vm7, %v248_v7  ;;  %v554_v52 = vsel %vm552_vm11, %v1403_v1, 0.0  ;;  %v968_v6 = vld [vmem:[%s2030_s1 + $0x380] sm:$0xff]  ;;  %v863_v7 = vld [vmem:[%s2030_s1 + $0x308] sm:$0xff] }
  0x8a   :  { %1259 = vmatmul.msk.f32.gmra.mxu3 %vm75_vm7, %v198_v8  ;;  %582 = vmatpush.msra.mxu2 %v557_v5  ;;  %v1020_v5 = vld [vmem:[%s2030_s1 + $0x3b8] sm:$0xff]  ;;  %v1019_v8 = vld [vmem:[%s2030_s1 + $0x3b0] sm:$0xff] }
  0x8b   :  { %632 = vmatpush.msra.mxu3 %v609_v9  ;;  %680 = vmatpush.msrb.mxu0 %v663_v10  ;;  %v967_v9 = vld [vmem:[%s2030_s1 + $0x378] sm:$0xff] }
  0x8c   :  { %583 = vmatpush.msra.mxu2 %v556_v11  ;;  %v918_v10 = vld [vmem:[%s2030_s1 + $0x358] sm:$0xff] }
  0x8d   :  { %633 = vmatpush.msra.mxu3 %v608_v13  ;;  %681 = vmatpush.msrb.mxu0 %v662_v14  ;;  %v1018_v13 = vld [vmem:[%s2030_s1 + $0x3a8] sm:$0xff]  ;;  %v966_v14 = vld [vmem:[%s2030_s1 + $0x370] sm:$0xff] }
  0x8e   :  { %v245_v19 = vpop.permute.xlu1 %244  ;;  %v344_v20 = vpop.permute.xlu0 %343 }
  0x8f   :  { %vm247_vm5 = vcmp.eq.s32.totalorder %v245_v19, 1  ;;  %vm348_vm6 = vcmp.eq.s32.totalorder %v344_v20, 1  ;;  %634 = vmatpush.msra.mxu3 %v607_v16  ;;  %682 = vmatpush.msrb.mxu0 %v661_v17  ;;  %v1770_v32 = vpop.permute.xlu2 %496  ;;  %v1017_v20 = vld [vmem:[%s2030_s1 + $0x3a0] sm:$0xff] }
  0x90   :  { %v249_v22 = vsel %vm247_vm5, %v1398_v0, 0.0  ;;  %v350_v23 = vsel %vm348_vm6, %v1403_v1, 0.0  ;;  %vm501_vm14 = vcmp.eq.s32.totalorder %v1770_v32, 1  ;;  %v914_v32 = vld [vmem:[%s2030_s1 + $0x338] sm:$0xff] }
  0x91   :  { %1261 = vmatmul.msk.f32.gmra.mxu0 %vm75_vm7, %v249_v22  ;;  %1264 = vmatmul.msk.f32.vlgmr.msrb.gmra.mxu2 %vm75_vm7, %v350_v23  ;;  %v503_v63 = vsel %vm501_vm14, %v1403_v1, 0.0  ;;  %v965_v22 = vld [vmem:[%s2030_s1 + $0x368] sm:$0xff]  ;;  %v1016_v23 = vld [vmem:[%s2030_s1 + $0x398] sm:$0xff] }
  0x92   :  { %1266 = vmatmul.msk.f32.vlgmr.msrb.gmra.mxu3 %vm75_vm7, %v401_v25  ;;  %683 = vmatpush.msrb.mxu0 %v660_v21  ;;  %v917_v21 = vld [vmem:[%s2030_s1 + $0x350] sm:$0xff]  ;;  %v916_v25 = vld [vmem:[%s2030_s1 + $0x348] sm:$0xff] }
  0x93   :  { %782 = vmatpush.msrb.mxu2 %v765_v24  ;;  %833 = vmatpush.msrb.mxu3 %v816_v31  ;;  %v964_v24 = vld [vmem:[%s2030_s1 + $0x360] sm:$0xff] }
  0x94   :  { %684 = vmatpush.msrb.mxu0 %v659_v3  ;;  %v1071_v3 = vld [vmem:[%s2030_s1 + $0x3e8] sm:$0xff] }
  0x95   :  { %783 = vmatpush.msrb.mxu2 %v764_v26  ;;  %834 = vmatpush.msrb.mxu3 %v815_v37  ;;  %v915_v26 = vld [vmem:[%s2030_s1 + $0x340] sm:$0xff]  ;;  %v913_v37 = vld [vmem:[%s2030_s1 + $0x330] sm:$0xff] }
  0x96   :  { %v347_v29 = vpop.permute.xlu1 %346  ;;  %v293_v30 = vpop.permute.xlu0 %292  ;;  %685 = vmatpush.msrb.mxu0 %v658_v27  ;;  %v1070_v27 = vld [vmem:[%s2030_s1 + $0x3e0] sm:$0xff] }
  0x97   :  { %vm349_vm9 = vcmp.eq.s32.totalorder %v347_v29, 1  ;;  %vm297_vm10 = vcmp.eq.s32.totalorder %v293_v30, 1  ;;  %784 = vmatpush.msrb.mxu2 %v763_v28  ;;  %835 = vmatpush.msrb.mxu3 %v814_v41  ;;  %v650_v53 = vpop.permute.xlu2 %649  ;;  %v1015_v28 = vld [vmem:[%s2030_s1 + $0x390] sm:$0xff] }
  0x98   :  { %v351_v34 = vsel %vm349_vm9, %v1398_v0, 0.0  ;;  %v299_v35 = vsel %vm297_vm10, %v1403_v1, 0.0  ;;  %vm654_vm1 = vcmp.eq.s32.totalorder %v650_v53, 1 }
  0x99   :  { %1262 = vmatmul.msk.f32.vlgmr.msrb.gmra.mxu1 %vm75_vm7, %v299_v35  ;;  %1265 = vmatmul.msk.f32.gmra.mxu2 %vm75_vm7, %v351_v34  ;;  %v656_v17 = vsel %vm654_vm1, %v1403_v1, 0.0 }
  0x9a   :  { %1267 = vmatmul.msk.f32.gmra.mxu3 %vm75_vm7, %v402_v38  ;;  %785 = vmatpush.msrb.mxu2 %v762_v33  ;;  %v1068_v38 = vld [vmem:[%s2030_s1 + $0x3d0] sm:$0xff] }
  0x9b   :  { %731 = vmatpush.msrb.mxu1 %v714_v36  ;;  %836 = vmatpush.msrb.mxu3 %v813_v44  ;;  %v1069_v36 = vld [vmem:[%s2030_s1 + $0x3d8] sm:$0xff] }
  0x9c   :  { %786 = vmatpush.msrb.mxu2 %v761_v39  ;;  %v1067_v39 = vld [vmem:[%s2030_s1 + $0x3c8] sm:$0xff] }
  0x9d   :  { %732 = vmatpush.msrb.mxu1 %v713_v40  ;;  %837 = vmatpush.msrb.mxu3 %v812_v51 }
  0x9e   :  { %v296_v45 = vpop.permute.xlu1 %295  ;;  %v446_v46 = vpop.permute.xlu0 %445  ;;  %787 = vmatpush.msrb.mxu2 %v760_v42 }
  0x9f   :  { %vm298_vm12 = vcmp.eq.s32.totalorder %v296_v45, 1  ;;  %vm450_vm13 = vcmp.eq.s32.totalorder %v446_v46, 1  ;;  %733 = vmatpush.msrb.mxu1 %v712_v43  ;;  %838 = vmatpush.msrb.mxu3 %v811_v55  ;;  %v653_v11 = vpop.permute.xlu2 %652  ;;  %v1066_v45 = vld [vmem:[%s2030_s1 + $0x3c0] sm:$0xff] }
  0xa0   :  { %v300_v48 = vsel %vm298_vm12, %v1398_v0, 0.0  ;;  %v452_v49 = vsel %vm450_vm13, %v1403_v1, 0.0  ;;  %vm655_vm4 = vcmp.eq.s32.totalorder %v653_v11, 1 }
  0xa1   :  { %1263 = vmatmul.msk.f32.gmra.mxu1 %vm75_vm7, %v300_v48  ;;  %1268 = vmatmul.msk.f32.vlgmr.msra.gmra.mxu0 %vm75_vm7, %v452_v49  ;;  %v657_v33 = vsel %vm655_vm4, %v1398_v0, 0.0 }
  0xa2   :  { %1272 = vmatmul.msk.f32.vlgmr.msra.gmra.mxu2 %vm75_vm7, %v554_v52  ;;  %734 = vmatpush.msrb.mxu1 %v711_v47 }
  0xa3   :  { %884 = vmatpush.msra.mxu0 %v867_v50  ;;  %986 = vmatpush.msra.mxu2 %v969_v61 }
  0xa4   :  { %735 = vmatpush.msrb.mxu1 %v710_v54 }
  0xa5   :  { %885 = vmatpush.msra.mxu0 %v866_v56  ;;  %987 = vmatpush.msra.mxu2 %v968_v6 }
  0xa6   :  { %v599_v59 = vpop.permute.xlu1 %598  ;;  %v449_v60 = vpop.permute.xlu0 %448  ;;  %736 = vmatpush.msrb.mxu1 %v709_v57 }
  0xa7   :  { %vm603_vm15 = vcmp.eq.s32.totalorder %v599_v59, 1  ;;  %vm451_vm0 = vcmp.eq.s32.totalorder %v449_v60, 1  ;;  %886 = vmatpush.msra.mxu0 %v865_v58  ;;  %988 = vmatpush.msra.mxu2 %v967_v9  ;;  %v755_v29 = vpop.permute.xlu2 %754 }
  0xa8   :  { %v605_v2 = vsel %vm603_vm15, %v1403_v1, 0.0  ;;  %v453_v4 = vsel %vm451_vm0, %v1398_v0, 0.0  ;;  %vm757_vm8 = vcmp.eq.s32.totalorder %v755_v29, 1 }
  0xa9   :  { %1269 = vmatmul.msk.f32.gmra.mxu0 %vm75_vm7, %v453_v4  ;;  %1270 = vmatmul.msk.f32.vlgmr.msra.gmra.mxu1 %vm75_vm7, %v503_v63  ;;  %v759_v46 = vsel %vm757_vm8, %v1398_v0, 0.0  ;;  %vm1163_vm8 = vcmask 261120  }
  0xaa   :  { %1274 = vmatmul.msk.f32.vlgmr.msra.gmra.mxu3 %vm75_vm7, %v605_v2  ;;  %887 = vmatpush.msra.mxu0 %v864_v62 }
  0xab   :  { %1037 = vmatpush.msra.mxu3 %v1020_v5  ;;  %935 = vmatpush.msra.mxu1 %v918_v10 }
  0xac   :  { %888 = vmatpush.msra.mxu0 %v863_v7  ;;  %989 = vmatpush.msra.mxu2 %v966_v14 }
  0xad   :  { %1038 = vmatpush.msra.mxu3 %v1019_v8  ;;  %936 = vmatpush.msra.mxu1 %v917_v21 }
  0xae   :  { %v602_v15 = vpop.permute.xlu1 %601  ;;  %v551_v16 = vpop.permute.xlu0 %550  ;;  %889 = vmatpush.msra.mxu0 %v862_v12  ;;  %990 = vmatpush.msra.mxu2 %v965_v22 }
  0xaf   :  { %vm604_vm2 = vcmp.eq.s32.totalorder %v602_v15, 1  ;;  %vm553_vm3 = vcmp.eq.s32.totalorder %v551_v16, 1  ;;  %1039 = vmatpush.msra.mxu3 %v1018_v13  ;;  %937 = vmatpush.msra.mxu1 %v916_v25  ;;  %v704_v42 = vpop.permute.xlu2 %703 }
  0xb0   :  { %v606_v18 = vsel %vm604_vm2, %v1398_v0, 0.0  ;;  %v555_v19 = vsel %vm553_vm3, %v1398_v0, 0.0  ;;  %991 = vmatpush.msra.mxu2 %v964_v24  ;;  %vm706_vm11 = vcmp.eq.s32.totalorder %v704_v42, 1 }
  0xb1   :  { %1273 = vmatmul.msk.f32.gmra.mxu2 %vm75_vm7, %v555_v19  ;;  %1276 = vmatmul.msk.f32.vlgmr.msrb.gmra.mxu0 %vm75_vm7, %v656_v17 }
  0xb2   :  { %1275 = vmatmul.msk.f32.gmra.mxu3 %vm75_vm7, %v606_v18  ;;  %1088 = vmatpush.msrb.mxu0 %v1071_v3 }
  0xb3   :  { %1040 = vmatpush.msra.mxu3 %v1017_v20  ;;  %938 = vmatpush.msra.mxu1 %v915_v26 }
  0xb4   :  { %1089 = vmatpush.msrb.mxu0 %v1070_v27 }
  0xb5   :  { %1041 = vmatpush.msra.mxu3 %v1016_v23  ;;  %939 = vmatpush.msra.mxu1 %v914_v32 }
  0xb6   :  { %v752_v30 = vpop.permute.xlu1 %751  ;;  %v500_v31 = vpop.permute.xlu0 %499  ;;  %1090 = vmatpush.msrb.mxu0 %v1069_v36 }
  0xb7   :  { %vm756_vm5 = vcmp.eq.s32.totalorder %v752_v30, 1  ;;  %vm502_vm6 = vcmp.eq.s32.totalorder %v500_v31, 1  ;;  %1042 = vmatpush.msra.mxu3 %v1015_v28  ;;  %940 = vmatpush.msra.mxu1 %v913_v37  ;;  %v1007_v52 = vpop.permute.xlu2 %1006  ;;  %v1118_v37 = vld [vmem:[%s2032_s3 + $0x38] sm:$0xff] }
  0xb8   :  { %v758_v34 = vsel %vm756_vm5, %v1403_v1, 0.0  ;;  %v504_v35 = vsel %vm502_vm6, %v1398_v0, 0.0  ;;  %1091 = vmatpush.msrb.mxu0 %v1068_v38  ;;  %v1313_v0 = vld [vmem:[%s2029_s0] sm:$0xff]  ;;  %vm1011_vm14 = vcmp.eq.s32.totalorder %v1007_v52, 1 }
  0xb9   :  { %1271 = vmatmul.msk.f32.gmra.mxu1 %vm75_vm7, %v504_v35  ;;  %1277 = vmatmul.msk.f32.gmra.mxu0 %vm75_vm7, %v657_v33  ;;  %v1013_v55 = vsel %vm1011_vm14, %v1313_v0, 0.0 }
  0xba   :  { %1280 = vmatmul.msk.f32.vlgmr.msrb.gmra.mxu2 %vm75_vm7, %v758_v34  ;;  %1092 = vmatpush.msrb.mxu0 %v1067_v39 }
  0xbc   :  { %1093 = vmatpush.msrb.mxu0 %v1066_v45 }
  0xbe   :  { %v701_v40 = vpop.permute.xlu1 %700  ;;  %v803_v41 = vpop.permute.xlu0 %802 }
  0xbf   :  { %vm705_vm9 = vcmp.eq.s32.totalorder %v701_v40, 1  ;;  %vm807_vm10 = vcmp.eq.s32.totalorder %v803_v41, 1  ;;  %v1010_v58 = vpop.permute.xlu2 %1009  ;;  %v1117_v40 = vld [vmem:[%s2032_s3 + $0x30] sm:$0xff] }
  0xc0   :  { %v707_v43 = vsel %vm705_vm9, %v1403_v1, 0.0  ;;  %v809_v44 = vsel %vm807_vm10, %v1403_v1, 0.0  ;;  %v1312_v1 = vld [vmem:[%s2029_s0 + $0x8] sm:$0xff]  ;;  %vm1012_vm1 = vcmp.eq.s32.totalorder %v1010_v58, 1 }
  0xc1   :  { %1278 = vmatmul.msk.f32.vlgmr.msrb.gmra.mxu1 %vm75_vm7, %v707_v43  ;;  %1282 = vmatmul.msk.f32.vlgmr.msrb.gmra.mxu3 %vm75_vm7, %v809_v44  ;;  %v708_v49 = vsel %vm706_vm11, %v1312_v1, 0.0  ;;  %v1014_v63 = vsel %vm1012_vm1, %v1312_v1, 0.0  ;;  %v1116_v43 = vld [vmem:[%s2032_s3 + $0x28] sm:$0xff] }
  0xc2   :  { %1281 = vmatmul.msk.f32.gmra.mxu2 %vm75_vm7, %v759_v46  ;;  %1138 = vmatpush.msrb.mxu1 %v1118_v37  ;;  %v1115_v46 = vld [vmem:[%s2032_s3 + $0x20] sm:$0xff] }
  0xc4   :  { %1139 = vmatpush.msrb.mxu1 %v1117_v40 }
  0xc6   :  { %v854_v47 = vpop.permute.xlu1 %853  ;;  %v806_v48 = vpop.permute.xlu0 %805  ;;  %1140 = vmatpush.msrb.mxu1 %v1116_v43  ;;  %v1198_v43 = vld [vmem:[%s2036_s7 + $0x18] sm:$0xff] }
  0xc7   :  { %vm858_vm12 = vcmp.eq.s32.totalorder %v854_v47, 1  ;;  %vm808_vm13 = vcmp.eq.s32.totalorder %v806_v48, 1  ;;  %v1061_v7 = vpop.permute.xlu2 %1060  ;;  %1221 = vmatpush.msrb.mxu3 %v1198_v43 }
  0xc8   :  { %v860_v50 = vsel %vm858_vm12, %v1313_v0, 0.0  ;;  %v810_v51 = vsel %vm808_vm13, %v1312_v1, 0.0  ;;  %vm1063_vm6 = vcmp.eq.s32.totalorder %v1061_v7, 1  ;;  %1141 = vmatpush.msrb.mxu1 %v1115_v46  ;;  %v1158_v7 = vld [vmem:[%s2034_s5 + $0x18] sm:$0xff]  ;;  %v1309_v46 = vld [vmem:[%s2033_s4] ss:$0 sm:$0xff] }
  0xc9   :  { %1279 = vmatmul.msk.f32.gmra.mxu1 %vm75_vm7, %v708_v49  ;;  %1283 = vmatmul.msk.f32.gmra.mxu3 %vm75_vm7, %v810_v51  ;;  %v1065_v8 = vsel %vm1063_vm6, %v1312_v1, 0.0  ;;  %v1114_v49 = vld [vmem:[%s2032_s3 + $0x18] sm:$0xff]  ;;  %v1113_v51 = vld [vmem:[%s2032_s3 + $0x10] sm:$0xff] }
  0xca   :  { %1284 = vmatmul.msk.f32.vlgmr.msra.gmra.mxu0 %vm75_vm7, %v860_v50  ;;  %1142 = vmatpush.msrb.mxu1 %v1114_v49 }
  0xcb   :  { %1182 = vmatpush.msrb.mxu2 %v1158_v7 }
  0xcc   :  { %1143 = vmatpush.msrb.mxu1 %v1113_v51  ;;  %v1195_v51 = vld [vmem:[%s2036_s7] sm:$0xff] }
  0xce   :  { %v857_v53 = vpop.permute.xlu1 %856  ;;  %v956_v54 = vpop.permute.xlu0 %955 }
  0xcf   :  { %vm859_vm15 = vcmp.eq.s32.totalorder %v857_v53, 1  ;;  %vm960_vm0 = vcmp.eq.s32.totalorder %v956_v54, 1  ;;  %v1112_v53 = vld [vmem:[%s2032_s3 + $0x8] sm:$0xff] }
  0xd0   :  { %v861_v56 = vsel %vm859_vm15, %v1312_v1, 0.0  ;;  %v962_v57 = vsel %vm960_vm0, %v1313_v0, 0.0  ;;  %1144 = vmatpush.msrb.mxu1 %v1112_v53 }
  0xd1   :  { %1288 = vmatmul.msk.f32.vlgmr.msra.gmra.mxu2 %vm75_vm7, %v962_v57  ;;  %1290 = vmatmul.msk.f32.vlgmr.msra.gmra.mxu3 %vm75_vm7, %v1013_v55  ;;  %v1111_v57 = vld [vmem:[%s2032_s3] sm:$0xff] }
  0xd2   :  { %1285 = vmatmul.msk.f32.gmra.mxu0 %vm75_vm7, %v861_v56  ;;  %1145 = vmatpush.msrb.mxu1 %v1111_v57 }
  0xd6   :  { %v959_v59 = vpop.permute.xlu1 %958  ;;  %v905_v60 = vpop.permute.xlu0 %904 }
  0xd7   :  { %vm961_vm2 = vcmp.eq.s32.totalorder %v959_v59, 1  ;;  %vm909_vm3 = vcmp.eq.s32.totalorder %v905_v60, 1 }
  0xd8   :  { %v963_v61 = vsel %vm961_vm2, %v1312_v1, 0.0  ;;  %v911_v62 = vsel %vm909_vm3, %v1313_v0, 0.0 }
  0xd9   :  { %1286 = vmatmul.msk.f32.vlgmr.msra.gmra.mxu1 %vm75_vm7, %v911_v62  ;;  %1289 = vmatmul.msk.f32.gmra.mxu2 %vm75_vm7, %v963_v61 }
  0xda   :  { %1291 = vmatmul.msk.f32.gmra.mxu3 %vm75_vm7, %v1014_v63 }
  0xde   :  { %v908_v2 = vpop.permute.xlu1 %907  ;;  %v1058_v4 = vpop.permute.xlu0 %1057 }
  0xdf   :  { %vm910_vm4 = vcmp.eq.s32.totalorder %v908_v2, 1  ;;  %vm1062_vm5 = vcmp.eq.s32.totalorder %v1058_v4, 1  ;;  %v128_v12 = vpop.f32.mrf.mxu1 }
  0xe0   :  { %v912_v5 = vsel %vm910_vm4, %v1312_v1, 0.0  ;;  %v1064_v6 = vsel %vm1062_vm5, %v1313_v0, 0.0 }
  0xe1   :  { %1287 = vmatmul.msk.f32.gmra.mxu1 %vm75_vm7, %v912_v5  ;;  %1292 = vmatmul.msk.f32.vlgmr.msrb.gmra.mxu0 %vm75_vm7, %v1064_v6 }
  0xe9   :  { %1293 = vmatmul.msk.f32.gmra.mxu0 %vm75_vm7, %v1065_v8  ;;  %v1157_v8 = vld [vmem:[%s2034_s5 + $0x10] sm:$0xff]  ;;  %vm1123_vm7 = vcmask 523264  }
  0xea   :  { %1183 = vmatpush.msrb.mxu2 %v1157_v8 }
  0xef   :  { %v131_v16 = vpop.f32.mrf.mxu1 }
  0xf6   :  { %v99_v9 = vpop.f32.mrf.mxu0 }
  0xf7   :  { %v129_v23 = vadd.f32 %v128_v12, %v99_v9  ;;  %v1156_v12 = vld [vmem:[%s2034_s5 + $0x8] sm:$0xff] }
  0xf8   :  { %1184 = vmatpush.msrb.mxu2 %v1156_v12 }
  0xfe   :  { %v102_v10 = vpop.f32.mrf.mxu0 }
  0xff   :  { %v132_v27 = vadd.f32 %v131_v16, %v102_v10 }
 0x104   :  { %v177_v11 = vpop.f32.mrf.mxu2 }
 0x105   :  { %v228_v13 = vpop.f32.mrf.mxu3  ;;  %v183_v3 = vadd.f32 %v177_v11, %v129_v23 }
 0x106   :  { %v279_v14 = vpop.f32.mrf.mxu0 }
 0x107   :  { %v234_v28 = vadd.f32 %v228_v13, %v183_v3 }
 0x109   :  { %v285_v31 = vadd.f32 %v279_v14, %v234_v28 }
 0x10c   :  { %v180_v15 = vpop.f32.mrf.mxu2 }
 0x10d   :  { %v231_v17 = vpop.f32.mrf.mxu3  ;;  %v184_v29 = vadd.f32 %v180_v15, %v132_v27  ;;  %v1308_v27 = vld [vmem:[%s2031_s2] ss:$0 sm:$0xff] }
 0x10e   :  { %v282_v18 = vpop.f32.mrf.mxu0 }
 0x10f   :  { %v235_v34 = vadd.f32 %v231_v17, %v184_v29 }
 0x111   :  { %v286_v38 = vadd.f32 %v282_v18, %v235_v34 }
 0x114   :  { %v381_v19 = vpop.f32.mrf.mxu2 }
 0x115   :  { %v432_v21 = vpop.f32.mrf.mxu3 }
 0x116   :  { %v330_v20 = vpop.f32.mrf.mxu1 }
 0x117   :  { %v336_v35 = vadd.f32 %v330_v20, %v285_v31 }
 0x119   :  { %v387_v39 = vadd.f32 %v381_v19, %v336_v35 }
 0x11b   :  { %v438_v47 = vadd.f32 %v432_v21, %v387_v39 }
 0x11c   :  { %v384_v24 = vpop.f32.mrf.mxu2 }
 0x11d   :  { %v435_v26 = vpop.f32.mrf.mxu3 }
 0x11e   :  { %v483_v22 = vpop.f32.mrf.mxu0  ;;  %v333_v25 = vpop.f32.mrf.mxu1 }
 0x11f   :  { %v337_v41 = vadd.f32 %v333_v25, %v286_v38  ;;  %v489_v1 = vadd.f32 %v483_v22, %v438_v47 }
 0x121   :  { %v388_v48 = vadd.f32 %v384_v24, %v337_v41 }
 0x123   :  { %v439_v52 = vadd.f32 %v435_v26, %v388_v48 }
 0x125   :  { %v585_v32 = vpop.f32.mrf.mxu2 }
 0x126   :  { %v486_v30 = vpop.f32.mrf.mxu0  ;;  %v534_v33 = vpop.f32.mrf.mxu1 }
 0x127   :  { %v540_v50 = vadd.f32 %v534_v33, %v489_v1  ;;  %v490_v54 = vadd.f32 %v486_v30, %v439_v52  ;;  %v1310_v52 = vld [vmem:[%s2035_s6] ss:$0 sm:$0xff] }
 0x129   :  { %v591_v55 = vadd.f32 %v585_v32, %v540_v50 }
 0x12d   :  { %v636_v36 = vpop.f32.mrf.mxu3 }
 0x12e   :  { %v687_v42 = vpop.f32.mrf.mxu0  ;;  %v642_v60 = vadd.f32 %v636_v36, %v591_v55 }
 0x130   :  { %v693_v63 = vadd.f32 %v687_v42, %v642_v60  ;;  %v1155_v42 = vld [vmem:[%s2034_s5] sm:$0xff] }
 0x131   :  { %1185 = vmatpush.msrb.mxu2 %v1155_v42 }
 0x134   :  { %v588_v44 = vpop.f32.mrf.mxu2 }
 0x135   :  { %v639_v0 = vpop.f32.mrf.mxu3 }
 0x136   :  { %v537_v45 = vpop.f32.mrf.mxu1  ;;  %v690_v56 = vpop.f32.mrf.mxu0 }
 0x137   :  { %v541_v61 = vadd.f32 %v537_v45, %v490_v54  ;;  %v1196_v45 = vld [vmem:[%s2036_s7 + $0x8] sm:$0xff] }
 0x139   :  { %v592_v2 = vadd.f32 %v588_v44, %v541_v61  ;;  %v1197_v44 = vld [vmem:[%s2036_s7 + $0x10] sm:$0xff]  ;;  %s1342_s7 = smov [#allocation2]  }
 0x13a   :  { %1222 = vmatpush.msrb.mxu3 %v1197_v44  ;;  %s1238_s6 = sshll.u32 %s1342_s7, 4  ;;  %s1239_s6 = int_to_ptr.vmem [resolvable:$true] %s1238_s6 }
 0x13b   :  { %v643_v6 = vadd.f32 %v639_v0, %v592_v2 }
 0x13c   :  { %1223 = vmatpush.msrb.mxu3 %v1196_v45 }
 0x13d   :  { %v789_v58 = vpop.f32.mrf.mxu2  ;;  %v694_v14 = vadd.f32 %v690_v56, %v643_v6 }
 0x13e   :  { %v738_v59 = vpop.f32.mrf.mxu1  ;;  %1224 = vmatpush.msrb.mxu3 %v1195_v51 }
 0x13f   :  { %v744_v4 = vadd.f32 %v738_v59, %v693_v63  ;;  %v1311_v59 = vld [vmem:[%s2037_s8] ss:$0 sm:$0xff] }
 0x141   :  { %v795_v11 = vadd.f32 %v789_v58, %v744_v4 }
 0x144   :  { %v840_v62 = vpop.f32.mrf.mxu3 }
 0x145   :  { %v792_v9 = vpop.f32.mrf.mxu2  ;;  %v846_v15 = vadd.f32 %v840_v62, %v795_v11 }
 0x146   :  { %v741_v10 = vpop.f32.mrf.mxu1 }
 0x147   :  { %v891_v5 = vpop.f32.mrf.mxu0  ;;  %v745_v16 = vadd.f32 %v741_v10, %v694_v14 }
 0x148   :  { %v897_v17 = vadd.f32 %v891_v5, %v846_v15 }
 0x149   :  { %v796_v21 = vadd.f32 %v792_v9, %v745_v16 }
 0x14c   :  { %v843_v13 = vpop.f32.mrf.mxu3 }
 0x14d   :  { %v847_v23 = vadd.f32 %v843_v13, %v796_v21 }
 0x14f   :  { %v894_v18 = vpop.f32.mrf.mxu0 }
 0x150   :  { %v898_v3 = vadd.f32 %v894_v18, %v847_v23 }
 0x154   :  { %v993_v19 = vpop.f32.mrf.mxu2  ;;  %v1044_v25 = vpop.f32.mrf.mxu3 }
 0x156   :  { %v942_v20 = vpop.f32.mrf.mxu1 }
 0x157   :  { %v948_v22 = vadd.f32 %v942_v20, %v897_v17 }
 0x159   :  { %v999_v24 = vadd.f32 %v993_v19, %v948_v22 }
 0x15b   :  { %v1050_v26 = vadd.f32 %v1044_v25, %v999_v24 }
 0x15c   :  { %v996_v32 = vpop.f32.mrf.mxu2 }
 0x15d   :  { %v1047_v36 = vpop.f32.mrf.mxu3 }
 0x15e   :  { %v945_v28 = vpop.f32.mrf.mxu1  ;;  %v1095_v29 = vpop.f32.mrf.mxu0 }
 0x15f   :  { %v949_v30 = vadd.f32 %v945_v28, %v898_v3  ;;  %v1101_v31 = vadd.f32 %v1095_v29, %v1050_v26 }
 0x161   :  { %v1000_v33 = vadd.f32 %v996_v32, %v949_v30  ;;  %v1107_v34 = vadd.f32 %v1308_v27, %v1101_v31 }
 0x163   :  { %v1109_v35 = vmax.f32 %v1107_v34, 0.0  ;;  %v1051_v37 = vadd.f32 %v1047_v36, %v1000_v33 }
 0x165   :  { %1294 = vmatmul.msk.f32.vlgmr.msrb.gmra.mxu1 %vm1123_vm7, %v1109_v35 }
 0x166   :  { %v1098_v38 = vpop.f32.mrf.mxu0 }
 0x167   :  { %v1102_v39 = vadd.f32 %v1098_v38, %v1051_v37 }
 0x169   :  { %v1108_v40 = vadd.f32 %v1308_v27, %v1102_v39 }
 0x16b   :  { %v1110_v41 = vmax.f32 %v1108_v40, 0.0 }
 0x16d   :  { %1295 = vmatmul.msk.f32.gmra.mxu1 %vm1123_vm7, %v1110_v41 }
 0x1e2   :  { %v1147_v47 = vpop.f32.mrf.mxu1 }
 0x1e3   :  { %v1148_v48 = vadd.f32 %v1309_v46, %v1147_v47 }
 0x1e5   :  { %v1153_v1 = vmax.f32 %v1148_v48, 0.0 }
 0x1e7   :  { %1296 = vmatmul.msk.f32.vlgmr.msrb.gmra.mxu2 %vm1163_vm8, %v1153_v1 }
 0x1ea   :  { %v1150_v49 = vpop.f32.mrf.mxu1 }
 0x1eb   :  { %v1151_v0 = vadd.f32 %v1309_v46, %v1150_v49 }
 0x1ed   :  { %v1154_v50 = vmax.f32 %v1151_v0, 0.0 }
 0x1ef   :  { %1297 = vmatmul.msk.f32.gmra.mxu2 %vm1163_vm8, %v1154_v50 }
 0x26a   :  { %v1187_v53 = vpop.f32.mrf.mxu2 }
 0x26b   :  { %v1188_v54 = vadd.f32 %v1310_v52, %v1187_v53 }
 0x26d   :  { %v1193_v55 = vmax.f32 %v1188_v54, 0.0 }
 0x26f   :  { %1298 = vmatmul.msk.f32.vlgmr.msrb.gmra.mxu3 %vm1163_vm8, %v1193_v55 }
 0x272   :  { %v1190_v56 = vpop.f32.mrf.mxu2 }
 0x273   :  { %v1191_v57 = vadd.f32 %v1310_v52, %v1190_v56 }
 0x275   :  { %v1194_v58 = vmax.f32 %v1191_v57, 0.0 }
 0x277   :  { %1299 = vmatmul.msk.f32.gmra.mxu3 %vm1163_vm8, %v1194_v58 }
 0x2f2   :  { %v1226_v60 = vpop.f32.mrf.mxu3 }
 0x2f3   :  { %v1227_v61 = vadd.f32 %v1311_v59, %v1226_v60 }
 0x2f5   :  { %1232 = vst.msk [vmem:[#allocation2] sm:$0xff] %vm1163_vm8, %v1227_v61 }
 0x2fa   :  { %v1229_v62 = vpop.f32.mrf.mxu3 }
 0x2fb   :  { %v1230_v63 = vadd.f32 %v1311_v59, %v1229_v62 }
 0x2fd   :  { %1233 = vst.msk [vmem:[#allocation2 + $0x8] sm:$0xff] %vm1163_vm8, %v1230_v63 }
 0x2fe   :  { %1246 = dma.vmem_to_hbm [thread:$0]  %s1239_s6, 256, %s1241_s30, [#allocation3], %s1343_s10, %s1343_s10, %s1344_s11  }
 0x2ff   :  { %1338 = dma.done.wait [#allocation3], 256  }
 0x300   :  { %1339 = vsyncadd [#allocation3], 4294967040 }
 0x301   :  { %1251 = vsyncpa [#allocation3], 1 }

</bundles_post_ra>
